<compile_context>
chip_gen: v7x
topology: tpu7x:2x2x1
jax: 0.10.0
libtpu: 0.0.40
codegen_flags: <defaults>
</compile_context>

<pallas_src>
import functools

import jax
import jax.numpy as jnp
import numpy as np
from jax.experimental import pallas as pl
from jax.experimental.pallas import tpu as pltpu


def _round_up(v, m):
    return (v + m - 1) // m * m


def _pick_tile_h(H, W, Cp, budget_bytes=8 << 20):
    """Largest divisor of H whose (in + out) f32 stripe blocks (double-buffered) fit budget."""
    wp = W + 2
    cap = max(1, H // 2) if H > 1 else 1      # prefer >= 2 stripes for pipeline depth
    best = 1
    for t in range(1, H + 1):
        if H % t:
            continue
        cost = 2 * 4 * wp * Cp * ((t + 2) + t)   # x stripe + out stripe, x2 buffers, f32
        if t <= cap and cost <= budget_bytes:
            best = t
    return best


def elic_residual_kernel(x_ref, w1_ref, w2_ref, w3_ref, o_ref, h1_ref, *,
                         wp, tile_h, compute_dtype):
    """One (batch, row-stripe) tile per grid step.

    x_ref : (1, 1, (tile_h+2)*wp, Cp)  haloed input stripe, channels-last, flag channel at C
    w1_ref: (Cp, Cmp)                  1x1 conv with b1 folded into the flag row
    w2_ref: (9, Cmp, Cmp)              3x3 conv taps (ky*3+kx); b2 folded into center tap
    w3_ref: (Cmp, Cp)                  1x1 conv with b3 folded into the flag row
    o_ref : (1, 1, tile_h*wp, Cp)      output stripe (still contains L/R pad cols, sliced off
                                       in the wrapper)
    h1_ref: ((tile_h+3)*wp, Cmp)       f32 VMEM halo scratch for the 3x3 stage
    """
    in_rows = (tile_h + 2) * wp
    out_rows = tile_h * wp
    cmid = h1_ref.shape[-1]

    x = x_ref[0, 0]                                        # (in_rows, Cp) f32

    # --- conv1x1 + bias + ReLU (bias via the ones-flag channel; padding pixels stay 0) ---
    h1 = jnp.dot(x.astype(compute_dtype), w1_ref[...],
                 preferred_element_type=jnp.float32)
    h1 = jnp.maximum(h1, 0.0)                              # (in_rows, Cmp)

    # --- zero-halo scratch: index 0 and the tail are don't-care guards, h1 lives at [1:] ---
    h1_ref[...] = jnp.zeros(h1_ref.shape, h1_ref.dtype)
    h1_ref[pl.ds(1, in_rows), :] = h1

    # --- conv3x3 "same": 9 static-offset slices -> MXU matmuls, f32 accumulation ---
    acc = jnp.zeros((out_rows, cmid), jnp.float32)
    for ky in range(3):
        for kx in range(3):
            tap = h1_ref[pl.ds(ky * wp + kx, out_rows), :]
            acc = acc + jnp.dot(tap.astype(compute_dtype), w2_ref[ky * 3 + kx],
                                preferred_element_type=jnp.float32)
    h2 = jnp.maximum(acc, 0.0)                             # (out_rows, Cmp)

    # --- conv1x1 + bias (folded) + residual ---
    h3 = jnp.dot(h2.astype(compute_dtype), w3_ref[...],
                 preferred_element_type=jnp.float32)       # (out_rows, Cp)
    o_ref[0, 0] = (x[wp:wp + out_rows, :] + h3).astype(o_ref.dtype)


def _pack_weights(params, C, Cm, Cp, Cmp, dtype):
    """Pad weights to lane-dense shapes and fold biases/padding-mask via the flag channel."""
    w1, b1, w2, b2, w3, b3 = params

    w1p = jnp.zeros((Cp, Cmp), jnp.float32)
    w1p = w1p.at[:C, :Cm].set(w1)
    w1p = w1p.at[C, :Cm].set(b1)          # flag row adds b1 at real pixels
    w1p = w1p.at[C, Cm].set(1.0)          # propagate the flag into h1 channel Cm

    w2p = jnp.zeros((9, Cmp, Cmp), jnp.float32)
    w2p = w2p.at[:, :Cm, :Cm].set(w2.reshape(9, Cm, Cm))
    center = 4                            # (ky=1, kx=1)
    w2p = w2p.at[center, Cm, :Cm].set(b2)  # b2 added once via the center-pixel flag
    w2p = w2p.at[center, Cm, Cm].set(1.0)  # propagate the flag into h2 channel Cm

    w3p = jnp.zeros((Cmp, Cp), jnp.float32)
    w3p = w3p.at[:Cm, :C].set(w3)
    w3p = w3p.at[Cm, :C].set(b3)          # b3 via the flag

    return w1p.astype(dtype), w2p.astype(dtype), w3p.astype(dtype)


def elic_residual_unit(x_nchw, params, *, compute_dtype=jnp.float32, tile_h=None):
    """Forward pass of ELICResidualUnit. Input/output are NCHW (PyTorch convention)."""
    w1, _, _, _, _, _ = params
    N, C, H, W = x_nchw.shape
    Cm = w1.shape[1]
    assert Cm == C // 2

    Cp = _round_up(C + 1, 128)            # +1 for the ones-flag channel
    Cmp = _round_up(Cm + 1, 128)
    Wp = W + 2

    if tile_h is None:
        tile_h = _pick_tile_h(H, W, Cp)
    assert H % tile_h == 0
    S = H // tile_h
    in_rows = (tile_h + 2) * Wp
    out_rows = tile_h * Wp

    # NCHW -> NHWC, append flag channel (=1 on real pixels) and zero channel padding.
    x_nhwc = jnp.transpose(x_nchw, (0, 2, 3, 1)).astype(jnp.float32)
    x_aug = jnp.concatenate(
        [x_nhwc,
         jnp.ones((N, H, W, 1), jnp.float32),
         jnp.zeros((N, H, W, Cp - C - 1), jnp.float32)], axis=-1)
    # Zero spatial halo: flag=0 there, so all conv-path activations are exactly 0 ("same" pad).
    x_pad = jnp.pad(x_aug, ((0, 0), (1, 1), (1, 1), (0, 0)))
    # Overlapping row stripes (1-row halo each side), flattened to (rows, Cp).
    x_strips = jnp.stack(
        [x_pad[:, s * tile_h: s * tile_h + tile_h + 2] for s in range(S)], axis=1)
    x_strips = x_strips.reshape(N, S, in_rows, Cp)

    w1p, w2p, w3p = _pack_weights(params, C, Cm, Cp, Cmp, compute_dtype)
    wbytes = jnp.dtype(compute_dtype).itemsize

    # VMEM estimate (double-buffered blocks + scratch) -> explicit limit, sized for v7x too.
    est = (2 * (in_rows + out_rows) * Cp * 4
           + 2 * (Cp * Cmp + 9 * Cmp * Cmp + Cmp * Cp) * wbytes
           + (tile_h + 3) * Wp * Cmp * 4)
    vmem_limit = int(min(max(2 * est + (4 << 20), 16 << 20), 48 << 20))

    kernel = functools.partial(elic_residual_kernel, wp=Wp, tile_h=tile_h,
                               compute_dtype=compute_dtype)

    out = pl.pallas_call(
        kernel,
        out_shape=jax.ShapeDtypeStruct((N, S, out_rows, Cp), jnp.float32),
        grid_spec=pltpu.PrefetchScalarGridSpec(
            num_scalar_prefetch=0,
            grid=(N, S),
            in_specs=[
                pl.BlockSpec((1, 1, in_rows, Cp), lambda n, s: (n, s, 0, 0)),  # x stripes
                pl.BlockSpec((Cp, Cmp), lambda n, s: (0, 0)),                  # w1p
                pl.BlockSpec((9, Cmp, Cmp), lambda n, s: (0, 0, 0)),           # w2p (taps)
                pl.BlockSpec((Cmp, Cp), lambda n, s: (0, 0)),                  # w3p
            ],
            out_specs=pl.BlockSpec((1, 1, out_rows, Cp), lambda n, s: (n, s, 0, 0)),
            scratch_shapes=[pltpu.VMEM(((tile_h + 3) * Wp, Cmp), jnp.float32)],
        ),
        compiler_params=pltpu.CompilerParams(
            dimension_semantics=("parallel", "parallel"),
            vmem_limit_bytes=vmem_limit),
    )(x_strips, w1p, w2p, w3p)

    # (N, S, tile_h*Wp, Cp) -> (N, H, Wp, Cp) -> drop pad cols / pad channels -> NCHW
    out = out.reshape(N, S, tile_h, Wp, Cp).reshape(N, H, Wp, Cp)
    out = out[:, :, 1:W + 1, :C]
    return jnp.transpose(out, (0, 3, 1, 2)).astype(x_nchw.dtype)


def reference_forward(x_nchw, params):
    """Pure-JAX reference matching nn.Conv2d semantics (NCHW, 'same' padding)."""
    w1, b1, w2, b2, w3, b3 = params
    C = x_nchw.shape[1]
    Cm = C // 2

    w1_oihw = w1.T.reshape(Cm, C, 1, 1)
    w2_oihw = jnp.transpose(w2, (3, 2, 0, 1))
    w3_oihw = w3.T.reshape(C, Cm, 1, 1)

    def conv(x, w_oihw, b, pad):
        y = jax.lax.conv_general_dilated(
            x, w_oihw, window_strides=(1, 1),
            padding=[(pad, pad), (pad, pad)],
            dimension_numbers=("NCHW", "OIHW", "NCHW"))
        return y + b[None, :, None, None]

    h = jax.nn.relu(conv(x_nchw, w1_oihw, b1, 0))
    h = jax.nn.relu(conv(h, w2_oihw, b2, 1))
    h = conv(h, w3_oihw, b3, 0)
    return x_nchw + h


def make_params(key, channels):
    Cm = channels // 2
    ks = jax.random.split(key, 6)
    w1 = 0.1 * jax.random.normal(ks[0], (channels, Cm), jnp.float32)    # (cin, cout)
    b1 = 0.1 * jax.random.normal(ks[1], (Cm,), jnp.float32)
    w2 = 0.1 * jax.random.normal(ks[2], (3, 3, Cm, Cm), jnp.float32)    # (kh, kw, cin, cout)
    b2 = 0.1 * jax.random.normal(ks[3], (Cm,), jnp.float32)
    w3 = 0.1 * jax.random.normal(ks[4], (Cm, channels), jnp.float32)    # (cin, cout)
    b3 = 0.1 * jax.random.normal(ks[5], (channels,), jnp.float32)
    return (w1, b1, w2, b2, w3, b3)


if __name__ == "__main__":
    key = jax.random.PRNGKey(0)
    k_x, k_p = jax.random.split(key)

    N, C, H, W = 2, 4, 16, 16
    x = jax.random.normal(k_x, (N, C, H, W), jnp.float32)
    params = make_params(k_p, C)

    ref = jax.block_until_ready(reference_forward(x, params))

    # f32 path (matches the PyTorch module's numerics)
    out = jax.block_until_ready(elic_residual_unit(x, params))
    np.testing.assert_allclose(np.asarray(out), np.asarray(ref), rtol=1e-4, atol=1e-4)

    # bf16 MXU path with f32 accumulation (fast path; looser tolerance)
    out_bf16 = jax.block_until_ready(
        elic_residual_unit(x, params, compute_dtype=jnp.bfloat16))
    np.testing.assert_allclose(np.asarray(out_bf16), np.asarray(ref), rtol=2e-2, atol=2e-2)

    print("KERNEL_OK")
</pallas_src>

<mosaic_0001>
module attributes {stable_mosaic.version = 11 : i64} {
  func.func @elic_residual_kernel(%arg0: i32, %arg1: i32, %arg2: memref<1x1x180x128xf32, #tpu.memory_space<vmem>>, %arg3: memref<128x128xf32, #tpu.memory_space<vmem>>, %arg4: memref<9x128x128xf32, #tpu.memory_space<vmem>>, %arg5: memref<128x128xf32, #tpu.memory_space<vmem>>, %arg6: memref<1x1x144x128xf32, #tpu.memory_space<vmem>>, %arg7: memref<198x128xf32, #tpu.memory_space<vmem>>) attributes {dimension_semantics = [#tpu.dimension_semantics<parallel>, #tpu.dimension_semantics<parallel>], iteration_bounds = array<i64: 2, 2>, scalar_prefetch = 0 : i64, scratch_operands = 1 : i64, tpu.core_type = #tpu.core_type<tc>, window_params = [{transform_indices = @transform_0, window_bounds = array<i64: 1, 1, 180, 128>}, {pipeline_mode = #tpu.pipeline_mode<synchronous>, transform_indices = @transform_1, window_bounds = array<i64: 128, 128>}, {pipeline_mode = #tpu.pipeline_mode<synchronous>, transform_indices = @transform_2, window_bounds = array<i64: 9, 128, 128>}, {pipeline_mode = #tpu.pipeline_mode<synchronous>, transform_indices = @transform_3, window_bounds = array<i64: 128, 128>}, {transform_indices = @transform_4, window_bounds = array<i64: 1, 1, 144, 128>}]} {
    %c0 = arith.constant 0 : index
    %c0_0 = arith.constant 0 : index
    %c0_1 = arith.constant 0 : index
    %c0_2 = arith.constant 0 : index
    %0 = vector.load %arg2[%c0, %c0_0, %c0_1, %c0_2] : memref<1x1x180x128xf32, #tpu.memory_space<vmem>>, vector<1x1x180x128xf32>
    %1 = vector.shape_cast %0 : vector<1x1x180x128xf32> to vector<180x128xf32>
    %c0_3 = arith.constant 0 : index
    %c0_4 = arith.constant 0 : index
    %2 = vector.load %arg3[%c0_3, %c0_4] : memref<128x128xf32, #tpu.memory_space<vmem>>, vector<128x128xf32>
    %cst = arith.constant dense<0.000000e+00> : vector<180x128xf32>
    %3 = tpu.matmul %1, %2, %cst {dimension_numbers = #tpu.dot_dimension_numbers<[1], [0], [0], [1], [0, 0, 1, 1], [], []>} : vector<180x128xf32>, vector<128x128xf32>, vector<180x128xf32> -> vector<180x128xf32>
    %cst_5 = arith.constant 0.000000e+00 : f32
    %4 = vector.broadcast %cst_5 : f32 to vector<180x128xf32>
    %5 = arith.maximumf %3, %4 : vector<180x128xf32>
    %cst_6 = arith.constant 0.000000e+00 : f32
    %6 = vector.broadcast %cst_6 : f32 to vector<198x128xf32>
    %c0_7 = arith.constant 0 : index
    %c0_8 = arith.constant 0 : index
    %7 = vector.load %arg7[%c0_7, %c0_8] : memref<198x128xf32, #tpu.memory_space<vmem>>, vector<198x128xf32>
    tpu.vector_store %arg7[%c0_7, %c0_8], %6 {strides = array<i32>} : memref<198x128xf32, #tpu.memory_space<vmem>>, vector<198x128xf32>,
    %c1 = arith.constant 1 : index
    %c0_9 = arith.constant 0 : index
    %8 = vector.load %arg7[%c1, %c0_9] : memref<198x128xf32, #tpu.memory_space<vmem>>, vector<180x128xf32>
    tpu.vector_store %arg7[%c1, %c0_9], %5 {strides = array<i32>} : memref<198x128xf32, #tpu.memory_space<vmem>>, vector<180x128xf32>,
    %cst_10 = arith.constant 0.000000e+00 : f32
    %9 = vector.broadcast %cst_10 : f32 to vector<144x128xf32>
    %c0_11 = arith.constant 0 : index
    %c0_12 = arith.constant 0 : index
    %10 = vector.load %arg7[%c0_11, %c0_12] : memref<198x128xf32, #tpu.memory_space<vmem>>, vector<144x128xf32>
    %c0_13 = arith.constant 0 : index
    %c0_14 = arith.constant 0 : index
    %c0_15 = arith.constant 0 : index
    %11 = vector.load %arg4[%c0_13, %c0_14, %c0_15] : memref<9x128x128xf32, #tpu.memory_space<vmem>>, vector<1x128x128xf32>
    %12 = vector.shape_cast %11 : vector<1x128x128xf32> to vector<128x128xf32>
    %cst_16 = arith.constant dense<0.000000e+00> : vector<144x128xf32>
    %13 = tpu.matmul %10, %12, %cst_16 {dimension_numbers = #tpu.dot_dimension_numbers<[1], [0], [0], [1], [0, 0, 1, 1], [], []>} : vector<144x128xf32>, vector<128x128xf32>, vector<144x128xf32> -> vector<144x128xf32>
    %14 = arith.addf %9, %13 : vector<144x128xf32>
    %c1_17 = arith.constant 1 : index
    %c0_18 = arith.constant 0 : index
    %15 = vector.load %arg7[%c1_17, %c0_18] : memref<198x128xf32, #tpu.memory_space<vmem>>, vector<144x128xf32>
    %c1_19 = arith.constant 1 : index
    %c0_20 = arith.constant 0 : index
    %c0_21 = arith.constant 0 : index
    %16 = vector.load %arg4[%c1_19, %c0_20, %c0_21] : memref<9x128x128xf32, #tpu.memory_space<vmem>>, vector<1x128x128xf32>
    %17 = vector.shape_cast %16 : vector<1x128x128xf32> to vector<128x128xf32>
    %cst_22 = arith.constant dense<0.000000e+00> : vector<144x128xf32>
    %18 = tpu.matmul %15, %17, %cst_22 {dimension_numbers = #tpu.dot_dimension_numbers<[1], [0], [0], [1], [0, 0, 1, 1], [], []>} : vector<144x128xf32>, vector<128x128xf32>, vector<144x128xf32> -> vector<144x128xf32>
    %19 = arith.addf %14, %18 : vector<144x128xf32>
    %c2 = arith.constant 2 : index
    %c0_23 = arith.constant 0 : index
    %20 = vector.load %arg7[%c2, %c0_23] : memref<198x128xf32, #tpu.memory_space<vmem>>, vector<144x128xf32>
    %c2_24 = arith.constant 2 : index
    %c0_25 = arith.constant 0 : index
    %c0_26 = arith.constant 0 : index
    %21 = vector.load %arg4[%c2_24, %c0_25, %c0_26] : memref<9x128x128xf32, #tpu.memory_space<vmem>>, vector<1x128x128xf32>
    %22 = vector.shape_cast %21 : vector<1x128x128xf32> to vector<128x128xf32>
    %cst_27 = arith.constant dense<0.000000e+00> : vector<144x128xf32>
    %23 = tpu.matmul %20, %22, %cst_27 {dimension_numbers = #tpu.dot_dimension_numbers<[1], [0], [0], [1], [0, 0, 1, 1], [], []>} : vector<144x128xf32>, vector<128x128xf32>, vector<144x128xf32> -> vector<144x128xf32>
    %24 = arith.addf %19, %23 : vector<144x128xf32>
    %c18 = arith.constant 18 : index
    %c0_28 = arith.constant 0 : index
    %25 = vector.load %arg7[%c18, %c0_28] : memref<198x128xf32, #tpu.memory_space<vmem>>, vector<144x128xf32>
    %c3 = arith.constant 3 : index
    %c0_29 = arith.constant 0 : index
    %c0_30 = arith.constant 0 : index
    %26 = vector.load %arg4[%c3, %c0_29, %c0_30] : memref<9x128x128xf32, #tpu.memory_space<vmem>>, vector<1x128x128xf32>
    %27 = vector.shape_cast %26 : vector<1x128x128xf32> to vector<128x128xf32>
    %cst_31 = arith.constant dense<0.000000e+00> : vector<144x128xf32>
    %28 = tpu.matmul %25, %27, %cst_31 {dimension_numbers = #tpu.dot_dimension_numbers<[1], [0], [0], [1], [0, 0, 1, 1], [], []>} : vector<144x128xf32>, vector<128x128xf32>, vector<144x128xf32> -> vector<144x128xf32>
    %29 = arith.addf %24, %28 : vector<144x128xf32>
    %c19 = arith.constant 19 : index
    %c0_32 = arith.constant 0 : index
    %30 = vector.load %arg7[%c19, %c0_32] : memref<198x128xf32, #tpu.memory_space<vmem>>, vector<144x128xf32>
    %c4 = arith.constant 4 : index
    %c0_33 = arith.constant 0 : index
    %c0_34 = arith.constant 0 : index
    %31 = vector.load %arg4[%c4, %c0_33, %c0_34] : memref<9x128x128xf32, #tpu.memory_space<vmem>>, vector<1x128x128xf32>
    %32 = vector.shape_cast %31 : vector<1x128x128xf32> to vector<128x128xf32>
    %cst_35 = arith.constant dense<0.000000e+00> : vector<144x128xf32>
    %33 = tpu.matmul %30, %32, %cst_35 {dimension_numbers = #tpu.dot_dimension_numbers<[1], [0], [0], [1], [0, 0, 1, 1], [], []>} : vector<144x128xf32>, vector<128x128xf32>, vector<144x128xf32> -> vector<144x128xf32>
    %34 = arith.addf %29, %33 : vector<144x128xf32>
    %c20 = arith.constant 20 : index
    %c0_36 = arith.constant 0 : index
    %35 = vector.load %arg7[%c20, %c0_36] : memref<198x128xf32, #tpu.memory_space<vmem>>, vector<144x128xf32>
    %c5 = arith.constant 5 : index
    %c0_37 = arith.constant 0 : index
    %c0_38 = arith.constant 0 : index
    %36 = vector.load %arg4[%c5, %c0_37, %c0_38] : memref<9x128x128xf32, #tpu.memory_space<vmem>>, vector<1x128x128xf32>
    %37 = vector.shape_cast %36 : vector<1x128x128xf32> to vector<128x128xf32>
    %cst_39 = arith.constant dense<0.000000e+00> : vector<144x128xf32>
    %38 = tpu.matmul %35, %37, %cst_39 {dimension_numbers = #tpu.dot_dimension_numbers<[1], [0], [0], [1], [0, 0, 1, 1], [], []>} : vector<144x128xf32>, vector<128x128xf32>, vector<144x128xf32> -> vector<144x128xf32>
    %39 = arith.addf %34, %38 : vector<144x128xf32>
    %c36 = arith.constant 36 : index
    %c0_40 = arith.constant 0 : index
    %40 = vector.load %arg7[%c36, %c0_40] : memref<198x128xf32, #tpu.memory_space<vmem>>, vector<144x128xf32>
    %c6 = arith.constant 6 : index
    %c0_41 = arith.constant 0 : index
    %c0_42 = arith.constant 0 : index
    %41 = vector.load %arg4[%c6, %c0_41, %c0_42] : memref<9x128x128xf32, #tpu.memory_space<vmem>>, vector<1x128x128xf32>
    %42 = vector.shape_cast %41 : vector<1x128x128xf32> to vector<128x128xf32>
    %cst_43 = arith.constant dense<0.000000e+00> : vector<144x128xf32>
    %43 = tpu.matmul %40, %42, %cst_43 {dimension_numbers = #tpu.dot_dimension_numbers<[1], [0], [0], [1], [0, 0, 1, 1], [], []>} : vector<144x128xf32>, vector<128x128xf32>, vector<144x128xf32> -> vector<144x128xf32>
    %44 = arith.addf %39, %43 : vector<144x128xf32>
    %c37 = arith.constant 37 : index
    %c0_44 = arith.constant 0 : index
    %45 = vector.load %arg7[%c37, %c0_44] : memref<198x128xf32, #tpu.memory_space<vmem>>, vector<144x128xf32>
    %c7 = arith.constant 7 : index
    %c0_45 = arith.constant 0 : index
    %c0_46 = arith.constant 0 : index
    %46 = vector.load %arg4[%c7, %c0_45, %c0_46] : memref<9x128x128xf32, #tpu.memory_space<vmem>>, vector<1x128x128xf32>
    %47 = vector.shape_cast %46 : vector<1x128x128xf32> to vector<128x128xf32>
    %cst_47 = arith.constant dense<0.000000e+00> : vector<144x128xf32>
    %48 = tpu.matmul %45, %47, %cst_47 {dimension_numbers = #tpu.dot_dimension_numbers<[1], [0], [0], [1], [0, 0, 1, 1], [], []>} : vector<144x128xf32>, vector<128x128xf32>, vector<144x128xf32> -> vector<144x128xf32>
    %49 = arith.addf %44, %48 : vector<144x128xf32>
    %c38 = arith.constant 38 : index
    %c0_48 = arith.constant 0 : index
    %50 = vector.load %arg7[%c38, %c0_48] : memref<198x128xf32, #tpu.memory_space<vmem>>, vector<144x128xf32>
    %c8 = arith.constant 8 : index
    %c0_49 = arith.constant 0 : index
    %c0_50 = arith.constant 0 : index
    %51 = vector.load %arg4[%c8, %c0_49, %c0_50] : memref<9x128x128xf32, #tpu.memory_space<vmem>>, vector<1x128x128xf32>
    %52 = vector.shape_cast %51 : vector<1x128x128xf32> to vector<128x128xf32>
    %cst_51 = arith.constant dense<0.000000e+00> : vector<144x128xf32>
    %53 = tpu.matmul %50, %52, %cst_51 {dimension_numbers = #tpu.dot_dimension_numbers<[1], [0], [0], [1], [0, 0, 1, 1], [], []>} : vector<144x128xf32>, vector<128x128xf32>, vector<144x128xf32> -> vector<144x128xf32>
    %54 = arith.addf %49, %53 : vector<144x128xf32>
    %cst_52 = arith.constant 0.000000e+00 : f32
    %55 = vector.broadcast %cst_52 : f32 to vector<144x128xf32>
    %56 = arith.maximumf %54, %55 : vector<144x128xf32>
    %c0_53 = arith.constant 0 : index
    %c0_54 = arith.constant 0 : index
    %57 = vector.load %arg5[%c0_53, %c0_54] : memref<128x128xf32, #tpu.memory_space<vmem>>, vector<128x128xf32>
    %cst_55 = arith.constant dense<0.000000e+00> : vector<144x128xf32>
    %58 = tpu.matmul %56, %57, %cst_55 {dimension_numbers = #tpu.dot_dimension_numbers<[1], [0], [0], [1], [0, 0, 1, 1], [], []>} : vector<144x128xf32>, vector<128x128xf32>, vector<144x128xf32> -> vector<144x128xf32>
    %59 = vector.extract_strided_slice %1 {offsets = [18, 0], sizes = [144, 128], strides = [1, 1]} : vector<180x128xf32> to vector<144x128xf32>
    %60 = arith.addf %59, %58 : vector<144x128xf32>
    %c0_56 = arith.constant 0 : index
    %c0_57 = arith.constant 0 : index
    %c0_58 = arith.constant 0 : index
    %c0_59 = arith.constant 0 : index
    %61 = vector.load %arg6[%c0_56, %c0_57, %c0_58, %c0_59] : memref<1x1x144x128xf32, #tpu.memory_space<vmem>>, vector<1x1x144x128xf32>
    %62 = vector.shape_cast %61 : vector<1x1x144x128xf32> to vector<144x128xf32>
    %63 = vector.shape_cast %60 : vector<144x128xf32> to vector<1x1x144x128xf32>
    tpu.vector_store %arg6[%c0_56, %c0_57, %c0_58, %c0_59], %63 {strides = array<i32>} : memref<1x1x144x128xf32, #tpu.memory_space<vmem>>, vector<1x1x144x128xf32>,
    return
  }
  func.func @transform_0(%arg0: i32, %arg1: i32) -> (i32, i32, i32, i32) {
    %c0_i32 = arith.constant 0 : i32
    %c0_i32_0 = arith.constant 0 : i32
    %c0_i32_1 = arith.constant 0 : i32
    return %arg0, %arg1, %c0_i32, %c0_i32_0 : i32, i32, i32, i32
  }
  func.func @transform_1(%arg0: i32, %arg1: i32) -> (i32, i32) {
    %c0_i32 = arith.constant 0 : i32
    %c0_i32_0 = arith.constant 0 : i32
    %c0_i32_1 = arith.constant 0 : i32
    return %c0_i32, %c0_i32_0 : i32, i32
  }
  func.func @transform_2(%arg0: i32, %arg1: i32) -> (i32, i32, i32) {
    %c0_i32 = arith.constant 0 : i32
    %c0_i32_0 = arith.constant 0 : i32
    %c0_i32_1 = arith.constant 0 : i32
    %c0_i32_2 = arith.constant 0 : i32
    return %c0_i32, %c0_i32_0, %c0_i32_1 : i32, i32, i32
  }
  func.func @transform_3(%arg0: i32, %arg1: i32) -> (i32, i32) {
    %c0_i32 = arith.constant 0 : i32
    %c0_i32_0 = arith.constant 0 : i32
    %c0_i32_1 = arith.constant 0 : i32
    return %c0_i32, %c0_i32_0 : i32, i32
  }
  func.func @transform_4(%arg0: i32, %arg1: i32) -> (i32, i32, i32, i32) {
    %c0_i32 = arith.constant 0 : i32
    %c0_i32_0 = arith.constant 0 : i32
    %c0_i32_1 = arith.constant 0 : i32
    return %arg0, %arg1, %c0_i32, %c0_i32_0 : i32, i32, i32, i32
  }
}

</mosaic_0001>

<bundles_post_ra>
// kernel: tpu_custom_call.1
= control target key start
LH: loop header
LB: loop body
LE: loop exit
PB: predicated region body
PF: predicated region fallthrough
CT: control target
= control target key end

     0   :  { %9 = vsyncpa [#allocation4], 0  ;;  %s5706_s0 = inlined_call_operand.vmem [shape: f32[2,2,180,128], index: 0, kind: input, shape index: {}]   ;;  %s5707_s1 = inlined_call_operand.vmem [shape: f32[128,128], index: 1, kind: input, shape index: {}]   ;;  %s5708_s2 = inlined_call_operand.vmem [shape: f32[9,128,128], index: 2, kind: input, shape index: {}]   ;;  %s5709_s3 = inlined_call_operand.vmem [shape: f32[128,128], index: 3, kind: input, shape index: {}]   ;;  %s5710_s4 = inlined_call_operand.hbm [shape: f32[2,2,144,128], index: 4, kind: output, shape index: {}]  }
   0x1   :  { %11 = vsyncpa [#allocation4 + $0x1], 0  ;;  %s4688_s15 = smov 0   ;;  %s4690_s16 = smov 0  }
   0x2   :  { %s4692_s17 = smov 0   ;;  %s4694_s18 = smov 0  }
   0x3   :  { %s4696_s19 = smov 0   ;;  %s4698_s20 = smov 0  }
   0x4   :  { %s4700_s21 = smov 0   ;;  %s4702_s22 = smov 0  }
   0x5 LB: > { %s2750_s23 = sadd.s32 4294967295, %s4655_s22   ;;  %s2751_s24 = sadd.s32 4294967294, %s4655_s22   ;;  %s4655_s22 = sphi %s4702_s22, %s17_s22   ;;  %s4651_s21 = sphi %s4700_s21, %s5719_s21   ;;  %s4647_s20 = sphi %s4698_s20, %s5718_s20   ;;  %s4643_s19 = sphi %s4696_s19, %s5717_s19   ;;  %s4639_s18 = sphi %s4694_s18, %s5716_s18   ;;  %s4635_s17 = sphi %s4692_s17, %s5715_s17   ;;  %s4631_s16 = sphi %s4690_s16, %s5714_s16   ;;  %s4627_s15 = sphi %s4688_s15, %s5713_s15  }
   0x6   : > { %s26_s25 = sadd.s32 1, %s4647_s20  ;;  %s29_s26 = sadd.s32 1, %s4651_s21 }
   0x7   : > { %p27_p0 = scmp.ge.s32.totalorder %s26_s25, 2  ;;  %p139_p1 = scmp.ne.s32.totalorder %s4635_s17, %s4631_s16 }
   0x8   : > { %p140_p2 = scmp.eq.s32.totalorder %s2750_s23, 3  ;;  %p145_p5 = scmp.ne.s32.totalorder %s4631_s16, %s4627_s15 }
   0x9   : > { %s5721_s25 = smov (%p27_p0, %s26_s25), 0  ;;  %s5723_s26 = smov (!%p27_p0, %s29_s26), %s4651_s21 }
   0xa   : > { %s125_s27 = ssub.s32 %s4647_s20, %s5721_s25  ;;  %p4739_p3 = por %p140_p2, %p139_p1 }
   0xb   : > { %p31_p4 = scmp.ge.s32.totalorder %s5723_s26, 2  ;;  %p146_p6 = scmp.eq.s32.totalorder %s2751_s24, 3 }
   0xc   : > { %p2754_p7 = scmp.ge.s32.totalorder %s4655_s22, 1  ;;  %p185_p9 = scmp.lt.s32.totalorder %s4655_s22, 5 }
   0xd   : > { %s5725_s26 = smov (%p31_p4, %s5723_s26), 0  ;;  %p4748_p8 = por %p146_p6, %p145_p5 }
   0xe   : > { %s124_s30 = ssub.s32 %s4651_s21, %s5725_s26  ;;  %s129_s5 = sadd.s32 1, %s4635_s17 }
   0xf   : > { %s126_s6 = sor.u32 %s125_s27, %s124_s30  ;;  %p186_p10 = pnand %p2754_p7, %p185_p9 }
  0x10   : > { %p127_p11 = scmp.eq.s32.totalorder %s126_s6, 0  ;;  %v247_v0 = vld [vmem:[%s5707_s1] sm:$0xff] (!%p186_p10)  ;;  %v248_v1 = vld [vmem:[%s5707_s1 + $0x8] sm:$0xff] (!%p186_p10)  ;;  %v249_v2 = vld [vmem:[%s5707_s1 + $0x10] sm:$0xff] (!%p186_p10)  ;;  %v4657_v3 = vmov (!%p186_p10), 0.0|0.0   ;;  %vm4658_vm0 = vmmov (!%p186_p10), 0  }
  0x11   : > { %189 = sbr.rel (%p186_p10) target bundleno = 983 (0x3d7), region = 36  ;;  %3957 = vmatprep.subr.bf16.mxu0 (!%p186_p10), %v4657_v3  ;;  %v3958_v4 = vpack.c.bf16 (!%p186_p10), %v248_v1, %v247_v0  ;;  %v250_v5 = vld [vmem:[%s5707_s1 + $0x18] sm:$0xff] (!%p186_p10)  ;;  %v4659_v6 = vmov (!%p186_p10), 0.0   ;;  %v251_v8 = vld [vmem:[%s5707_s1 + $0x20] sm:$0xff] (!%p186_p10)  ;;  %v252_v9 = vld [vmem:[%s5707_s1 + $0x28] sm:$0xff] (!%p186_p10)  ;;  %p215_p12 = scmp.lt.s32.totalorder (!%p186_p10), %s4643_s19, 1 }
  0x12   : > { %s4757_s7 = scalar_select %p127_p11, %s4635_s17, %s129_s5  }
  0x13   : > { %3298 = vmatprep.mubr.msk.f32.mxu0 (!%p186_p10), %vm4658_vm0, %v4659_v6  ;;  %466 = vst [vmem:[#allocation2] sm:$0xff] (!%p186_p10), %v4659_v6  ;;  %467 = vst [vmem:[#allocation2 + $0x8] sm:$0xff] (!%p186_p10), %v4659_v6  ;;  %3959 = vmatpush3.bf16.msra.mxu0 (!%p186_p10), %v3958_v4  ;;  %v3961_v7 = vpack.c.bf16 (!%p186_p10), %v250_v5, %v249_v2  ;;  %v2772_v10 = vld [vmem:[%s5708_s2 + $0x100] sm:$0xff] (!%p186_p10)  ;;  %v3964_v11 = vpack.c.bf16 (!%p186_p10), %v252_v9, %v251_v8  ;;  %v253_v12 = vld [vmem:[%s5707_s1 + $0x30] sm:$0xff] (!%p186_p10)  ;;  %p217_p13 = scmp.lt.s32.totalorder (!%p186_p10), %s4639_s18, 1  ;;  %vm2556_vm1 = vcmask (!%p186_p10), 1041408  }
  0x14   : > { %468 = vst [vmem:[#allocation2 + $0x10] sm:$0xff] (!%p186_p10), %v4659_v6  ;;  %469 = vst [vmem:[#allocation2 + $0x18] sm:$0xff] (!%p186_p10), %v4659_v6  ;;  %3960 = vmatprep.subr.bf16.mxu0 (!%p186_p10), %v4657_v3  ;;  %v2773_v13 = vld [vmem:[%s5708_s2 + $0x108] sm:$0xff] (!%p186_p10)  ;;  %v254_v14 = vld [vmem:[%s5707_s1 + $0x38] sm:$0xff] (!%p186_p10)  ;;  %s4464_s6 = smul.u32 (!%p186_p10), 18, %s4639_s18  ;;  %s4660_s27 = smov (!%p186_p10), [#allocation3]  }
  0x15   : > { %470 = vst [vmem:[#allocation2 + $0x20] sm:$0xff] (!%p186_p10), %v4659_v6  ;;  %471 = vst [vmem:[#allocation2 + $0x28] sm:$0xff] (!%p186_p10), %v4659_v6  ;;  %v4045_v15 = vpack.c.bf16 (!%p186_p10), %v2773_v13, %v2772_v10  ;;  %v2774_v16 = vld [vmem:[%s5708_s2 + $0x110] sm:$0xff] (!%p186_p10)  ;;  %v2775_v17 = vld [vmem:[%s5708_s2 + $0x118] sm:$0xff] (!%p186_p10)  ;;  %v3967_v21 = vpack.c.bf16 (!%p186_p10), %v254_v14, %v253_v12  ;;  %s4465_s8 = smul.u32 (!%p186_p10), 36, %s4643_s19 }
  0x16   : > { %472 = vst [vmem:[#allocation2 + $0x30] sm:$0xff] (!%p186_p10), %v4659_v6  ;;  %473 = vst [vmem:[#allocation2 + $0x38] sm:$0xff] (!%p186_p10), %v4659_v6  ;;  %v4049_v18 = vpack.c.bf16 (!%p186_p10), %v2775_v17, %v2774_v16  ;;  %v2776_v19 = vld [vmem:[%s5708_s2 + $0x120] sm:$0xff] (!%p186_p10)  ;;  %v2777_v20 = vld [vmem:[%s5708_s2 + $0x128] sm:$0xff] (!%p186_p10) }
  0x17   : > { %474 = vst [vmem:[#allocation2 + $0x40] sm:$0xff] (!%p186_p10), %v4659_v6  ;;  %475 = vst [vmem:[#allocation2 + $0x48] sm:$0xff] (!%p186_p10), %v4659_v6  ;;  %3962 = vmatpush3.bf16.msra.mxu0 (!%p186_p10), %v3961_v7  ;;  %4046 = vmatprep.subr.bf16.mxu1 (!%p186_p10), %v4045_v15  ;;  %v255_v22 = vld [vmem:[%s5707_s1 + $0x40] sm:$0xff] (!%p186_p10)  ;;  %v256_v23 = vld [vmem:[%s5707_s1 + $0x48] sm:$0xff] (!%p186_p10)  ;;  %v4053_v24 = vpack.c.bf16 (!%p186_p10), %v2777_v20, %v2776_v19  ;;  %s2662_s12 = sadd.s32 (!%p186_p10), %s4465_s8, %s4464_s6 }
  0x18   : > { %476 = vst [vmem:[#allocation2 + $0x50] sm:$0xff] %v4659_v6  ;;  %477 = vst [vmem:[#allocation2 + $0x58] sm:$0xff] %v4659_v6  ;;  %3963 = vmatprep.subr.bf16.mxu0 %v4657_v3  ;;  %4048 = vmatpush3.bf16.msra.mxu1 %v4045_v15  ;;  %s216_s14 = scalar_select %p215_p12, %s4643_s19, 1  ;;  %v3970_v25 = vpack.c.bf16 %v256_v23, %v255_v22  ;;  %v257_v26 = vld [vmem:[%s5707_s1 + $0x50] sm:$0xff]  ;;  %v258_v27 = vld [vmem:[%s5707_s1 + $0x58] sm:$0xff] }
  0x19   : > { %478 = vst [vmem:[#allocation2 + $0x60] sm:$0xff] %v4659_v6  ;;  %479 = vst [vmem:[#allocation2 + $0x68] sm:$0xff] %v4659_v6  ;;  %4050 = vmatprep.subr.bf16.mxu1 %v4049_v18  ;;  %s218_s23 = scalar_select %p217_p13, %s4639_s18, 1  ;;  %v2778_v28 = vld [vmem:[%s5708_s2 + $0x130] sm:$0xff]  ;;  %v2779_v29 = vld [vmem:[%s5708_s2 + $0x138] sm:$0xff]  ;;  %v3973_v30 = vpack.c.bf16 %v258_v27, %v257_v26 }
  0x1a   : > { %480 = vst [vmem:[#allocation2 + $0x70] sm:$0xff] %v4659_v6  ;;  %481 = vst [vmem:[#allocation2 + $0x78] sm:$0xff] %v4659_v6  ;;  %s4463_s9 = smul.u32 46, %s216_s14  ;;  %v4057_v31 = vpack.c.bf16 %v2779_v29, %v2778_v28  ;;  %v259_v32 = vld [vmem:[%s5707_s1 + $0x60] sm:$0xff]  ;;  %v260_v33 = vld [vmem:[%s5707_s1 + $0x68] sm:$0xff]  ;;  %s2884_s18 = sshll.u32 %s2662_s12, 7 }
  0x1b   : > { %482 = vst [vmem:[#allocation2 + $0x80] sm:$0xff] %v4659_v6  ;;  %483 = vst [vmem:[#allocation2 + $0x88] sm:$0xff] %v4659_v6  ;;  %3965 = vmatpush3.bf16.msra.mxu0 %v3964_v11  ;;  %s4462_s10 = smul.u32 23, %s218_s23  ;;  %v3976_v34 = vpack.c.bf16 %v260_v33, %v259_v32  ;;  %v261_v35 = vld [vmem:[%s5707_s1 + $0x70] sm:$0xff]  ;;  %v262_v36 = vld [vmem:[%s5707_s1 + $0x78] sm:$0xff]  ;;  %s5648_s24 = scalar_lea.hbm %s5710_s4, %s2884_s18 }
  0x1c   : > { %484 = vst [vmem:[#allocation2 + $0x90] sm:$0xff] %v4659_v6  ;;  %485 = vst [vmem:[#allocation2 + $0x98] sm:$0xff] %v4659_v6  ;;  %3966 = vmatprep.subr.bf16.mxu0 %v4657_v3  ;;  %4052 = vmatpush3.bf16.msra.mxu1 %v4049_v18  ;;  %v2756_v37 = vld [vmem:[%s5708_s2 + $0x80] sm:$0xff]  ;;  %v2757_v38 = vld [vmem:[%s5708_s2 + $0x88] sm:$0xff]  ;;  %v3979_v39 = vpack.c.bf16 %v262_v36, %v261_v35 }
  0x1d   : > { %486 = vst [vmem:[#allocation2 + $0xa0] sm:$0xff] %v4659_v6  ;;  %487 = vst [vmem:[#allocation2 + $0xa8] sm:$0xff] %v4659_v6  ;;  %4054 = vmatprep.subr.bf16.mxu1 %v4053_v24  ;;  %s221_s14 = sadd.s32 %s4463_s9, %s4462_s10  ;;  %v3981_v40 = vpack.c.bf16 %v2757_v38, %v2756_v37  ;;  %v2758_v41 = vld [vmem:[%s5708_s2 + $0x90] sm:$0xff]  ;;  %v2759_v42 = vld [vmem:[%s5708_s2 + $0x98] sm:$0xff] }
  0x1e   : > { %488 = vst [vmem:[#allocation2 + $0xb0] sm:$0xff] %v4659_v6  ;;  %s2755_s11 = sshll.u32 %s221_s14, 3  ;;  %v3985_v44 = vpack.c.bf16 %v2759_v42, %v2758_v41  ;;  %v2760_v45 = vld [vmem:[%s5708_s2 + $0xa0] sm:$0xff]  ;;  %v2761_v46 = vld [vmem:[%s5708_s2 + $0xa8] sm:$0xff]  ;;  %v2762_v49 = vld [vmem:[%s5708_s2 + $0xb0] sm:$0xff]  ;;  %s212_s14 = sand.u32 1, %s4631_s16  }
  0x1f   : > { %3968 = vmatpush3.bf16.msra.mxu0 %v3967_v21  ;;  %s4879_s30 = scalar_lea.vmem %s5706_s0, %s2755_s11  ;;  %v3989_v48 = vpack.c.bf16 %v2761_v46, %v2760_v45  ;;  %v2763_v50 = vld [vmem:[%s5708_s2 + $0xb8] sm:$0xff]  ;;  %v2764_v53 = vld [vmem:[%s5708_s2 + $0xc0] sm:$0xff]  ;;  %v2765_v54 = vld [vmem:[%s5708_s2 + $0xc8] sm:$0xff]  ;;  %s4461_s23 = smul.u32 144, %s212_s14 }
  0x20   : > { %3969 = vmatprep.subr.bf16.mxu0 %v4657_v3  ;;  %4056 = vmatpush3.bf16.msra.mxu1 %v4053_v24  ;;  %v224_v43 = vld [vmem:[%s4879_s30] sm:$0xff]  ;;  %v225_v47 = vld [vmem:[%s4879_s30 + $0x8] sm:$0xff]  ;;  %v226_v51 = vld [vmem:[%s4879_s30 + $0x10] sm:$0xff]  ;;  %v3993_v52 = vpack.c.bf16 %v2763_v50, %v2762_v49  ;;  %v3997_v56 = vpack.c.bf16 %v2765_v54, %v2764_v53  ;;  %s5654_s9 = scalar_lea.sflag [#allocation4], %s212_s14 }
  0x21   : > { %4058 = vmatprep.subr.bf16.mxu1 %v4057_v31  ;;  %v227_v55 = vld [vmem:[%s4879_s30 + $0x18] sm:$0xff]  ;;  %v228_v57 = vld [vmem:[%s4879_s30 + $0x20] sm:$0xff]  ;;  %v229_v58 = vld [vmem:[%s4879_s30 + $0x28] sm:$0xff]  ;;  %s5588_s5 = scalar_lea.vmem [#allocation3], %s4461_s23  ;;  %s4565_s23 = sshll.u32 %s4660_s27, 4  ;;  %s4566_s23 = int_to_ptr.vmem [resolvable:$false] %s4565_s23 }
  0x22   : > { %v230_v59 = vld [vmem:[%s4879_s30 + $0x30] sm:$0xff]  ;;  %v231_v60 = vld [vmem:[%s4879_s30 + $0x38] sm:$0xff]  ;;  %v232_v61 = vld [vmem:[%s4879_s30 + $0x40] sm:$0xff]  ;;  %s2665_s11 = sshll.u32 %s5588_s5, 4  ;;  %s5640_s11 = int_to_ptr.vmem [resolvable:$true] %s2665_s11 }
  0x23   : > { %3971 = vmatpush3.bf16.msra.mxu0 %v3970_v25  ;;  %v233_v62 = vld [vmem:[%s4879_s30 + $0x48] sm:$0xff]  ;;  %v234_v63 = vld [vmem:[%s4879_s30 + $0x50] sm:$0xff]  ;;  %v235_v0 = vld [vmem:[%s4879_s30 + $0x58] sm:$0xff]  ;;  %s4561_s10 = scalar_lea.vmem %s5640_s11, 2304  ;;  %p4568_p4 = scmp.lt.s32.totalorder %s5640_s11, %s4566_s23 }
  0x24   : > { %3972 = vmatprep.subr.bf16.mxu0 %v4657_v3  ;;  %4060 = vmatpush3.bf16.msra.mxu1 %v4057_v31  ;;  %v236_v1 = vld [vmem:[%s4879_s30 + $0x60] sm:$0xff]  ;;  %v237_v2 = vld [vmem:[%s4879_s30 + $0x68] sm:$0xff]  ;;  %v239_v4 = vld [vmem:[%s4879_s30 + $0x78] sm:$0xff]  ;;  %p4562_p0 = scmp.ne.s32.totalorder %s5640_s11, %s4561_s10 }
  0x25   : > { %v240_v5 = vld [vmem:[%s4879_s30 + $0x80] sm:$0xff]  ;;  %v241_v7 = vld [vmem:[%s4879_s30 + $0x88] sm:$0xff]  ;;  %v242_v8 = vld [vmem:[%s4879_s30 + $0x90] sm:$0xff] }
  0x26   : > { %v243_v9 = vld [vmem:[%s4879_s30 + $0x98] sm:$0xff]  ;;  %v2766_v10 = vld [vmem:[%s5708_s2 + $0xd0] sm:$0xff]  ;;  %v244_v13 = vld [vmem:[%s4879_s30 + $0xa0] sm:$0xff]  ;;  %p4563_p1 = pnand %p4562_p0, %p4739_p3 }
  0x27   : > { %3974 = vmatpush3.bf16.msra.mxu0 %v3973_v30  ;;  %v2767_v11 = vld [vmem:[%s5708_s2 + $0xd8] sm:$0xff]  ;;  %v2768_v14 = vld [vmem:[%s5708_s2 + $0xe0] sm:$0xff]  ;;  %v2769_v15 = vld [vmem:[%s5708_s2 + $0xe8] sm:$0xff] }
  0x28   : > { %3975 = vmatprep.subr.bf16.mxu0 %v4657_v3  ;;  %v4001_v12 = vpack.c.bf16 %v2767_v11, %v2766_v10  ;;  %v4005_v16 = vpack.c.bf16 %v2769_v15, %v2768_v14  ;;  %v245_v17 = vld [vmem:[%s4879_s30 + $0xa8] sm:$0xff]  ;;  %v2780_v18 = vld [vmem:[%s5708_s2 + $0x140] sm:$0xff]  ;;  %v2770_v21 = vld [vmem:[%s5708_s2 + $0xf0] sm:$0xff]  ;;  %p4564_p2 = pneg %p4563_p1 }
  0x29   : > { %v2781_v19 = vld [vmem:[%s5708_s2 + $0x148] sm:$0xff]  ;;  %v2771_v22 = vld [vmem:[%s5708_s2 + $0xf8] sm:$0xff]  ;;  %v246_v23 = vld [vmem:[%s4879_s30 + $0xb0] sm:$0xf] }
  0x2a   : > { %v4061_v20 = vpack.c.bf16 %v2781_v19, %v2780_v18  ;;  %v4009_v24 = vpack.c.bf16 %v2771_v22, %v2770_v21  ;;  %v2782_v25 = vld [vmem:[%s5708_s2 + $0x150] sm:$0xff]  ;;  %v2783_v26 = vld [vmem:[%s5708_s2 + $0x158] sm:$0xff]  ;;  %v2785_v28 = vld [vmem:[%s5708_s2 + $0x168] sm:$0xff] }
  0x2b   : > { %3977 = vmatpush3.bf16.msra.mxu0 %v3976_v34  ;;  %v4065_v27 = vpack.c.bf16 %v2783_v26, %v2782_v25  ;;  %v2786_v30 = vld [vmem:[%s5708_s2 + $0x170] sm:$0xff]  ;;  %v2787_v31 = vld [vmem:[%s5708_s2 + $0x178] sm:$0xff]  ;;  %v532_v33 = vld [vmem:[%s5708_s2] sm:$0xff] }
  0x2c   : > { %3978 = vmatprep.subr.bf16.mxu0 %v4657_v3  ;;  %v238_v3 = vld [vmem:[%s4879_s30 + $0x70] sm:$0xff]  ;;  %4062 = vmatprep.subr.bf16.mxu1 %v4061_v20  ;;  %v4073_v32 = vpack.c.bf16 %v2787_v31, %v2786_v30  ;;  %v533_v34 = vld [vmem:[%s5708_s2 + $0x8] sm:$0xff]  ;;  %v2788_v36 = vld [vmem:[%s5708_s2 + $0x180] sm:$0xff] }
  0x2d   : > { %4064 = vmatpush3.bf16.msra.mxu1 %v4061_v20  ;;  %v4013_v35 = vpack.c.bf16 %v533_v34, %v532_v33  ;;  %v2789_v37 = vld [vmem:[%s5708_s2 + $0x188] sm:$0xff]  ;;  %v534_v42 = vld [vmem:[%s5708_s2 + $0x10] sm:$0xff]  ;;  %v543_v11 = vld [vmem:[%s5708_s2 + $0x58] sm:$0xff] }
  0x2e   : > { %4066 = vmatprep.subr.bf16.mxu1 %v4065_v27  ;;  %v4077_v38 = vpack.c.bf16 %v2789_v37, %v2788_v36  ;;  %v537_v49 = vld [vmem:[%s5708_s2 + $0x28] sm:$0xff]  ;;  %v538_v54 = vld [vmem:[%s5708_s2 + $0x30] sm:$0xff]  ;;  %v544_v20 = vld [vmem:[%s5708_s2 + $0x60] sm:$0xff] }
  0x2f   : > { %3980 = vmatpush3.bf16.msra.mxu0 %v3979_v39  ;;  %v542_v10 = vld [vmem:[%s5708_s2 + $0x50] sm:$0xff]  ;;  %v545_v21 = vld [vmem:[%s5708_s2 + $0x68] sm:$0xff]  ;;  %v2796_v26 = vld [vmem:[%s5708_s2 + $0x1c0] sm:$0xff] }
  0x30   : > { %3982 = vmatprep.subr.bf16.mxu0 %v3981_v40  ;;  %v4033_v18 = vpack.c.bf16 %v543_v11, %v542_v10  ;;  %v547_v30 = vld [vmem:[%s5708_s2 + $0x78] sm:$0xff] }
  0x31   : > { %4068 = vmatpush3.bf16.msra.mxu1 %v4065_v27  ;;  %v2797_v27 = vld [vmem:[%s5708_s2 + $0x1c8] sm:$0xff]  ;;  %v2799_v36 = vld [vmem:[%s5708_s2 + $0x1d8] sm:$0xff] }
  0x32   : > { %3299 = vmatmul.mubr.f32.vlgmr.msra.gmra.mrb[0].mxu0 %v224_v43  ;;  %v535_v43 = vld [vmem:[%s5708_s2 + $0x18] sm:$0xff]  ;;  %v4093_v34 = vpack.c.bf16 %v2797_v27, %v2796_v26 }
  0x33   : > { %3301 = vmatprep.mubr.msk.f32.mxu0 %vm4658_vm0, %v4659_v6  ;;  %3984 = vmatpush3.bf16.msra.mxu0 %v3981_v40 }
  0x34   : > { %3986 = vmatprep.subr.bf16.mxu0 %v3985_v44 }
  0x36   : > { %3302 = vmatmul.mubr.f32.gmra.mrb[2].mxu0 %v225_v47  ;;  %v4017_v47 = vpack.c.bf16 %v535_v43, %v534_v42 }
  0x37   : > { %3304 = vmatprep.mubr.msk.f32.mxu0 %vm4658_vm0, %v4659_v6  ;;  %3988 = vmatpush3.bf16.msra.mxu0 %v3985_v44 }
  0x38   : > { %3990 = vmatprep.subr.bf16.mxu0 %v3989_v48 }
  0x3a   : > { %3305 = vmatmul.mubr.f32.gmra.mrb[4].mxu0 %v226_v51 }
  0x3b   : > { %3307 = vmatprep.mubr.msk.f32.mxu0 %vm4658_vm0, %v4659_v6  ;;  %3992 = vmatpush3.bf16.msra.mxu0 %v3989_v48  ;;  %v536_v48 = vld [vmem:[%s5708_s2 + $0x20] sm:$0xff] }
  0x3c   : > { %3994 = vmatprep.subr.bf16.mxu0 %v3993_v52  ;;  %v4021_v53 = vpack.c.bf16 %v537_v49, %v536_v48  ;;  %v2801_v48 = vld [vmem:[%s5708_s2 + $0x1e8] sm:$0xff] }
  0x3e   : > { %3308 = vmatmul.mubr.f32.gmra.mrb[6].mxu0 %v227_v55  ;;  %v539_v55 = vld [vmem:[%s5708_s2 + $0x38] sm:$0xff] }
  0x3f   : > { %3310 = vmatprep.mubr.msk.f32.mxu0 %vm4658_vm0, %v4659_v6  ;;  %3996 = vmatpush3.bf16.msra.mxu0 %v3993_v52 }
  0x40   : > { %3998 = vmatprep.subr.bf16.mxu0 %v3997_v56 }
  0x42   : > { %3311 = vmatmul.mubr.f32.gmra.mrb[8].mxu0 %v228_v57 }
  0x43   : > { %3313 = vmatprep.mubr.msk.f32.mxu0 %vm4658_vm0, %v4659_v6  ;;  %4000 = vmatpush3.bf16.msra.mxu0 %v3997_v56 }
  0x44   : > { %4002 = vmatprep.subr.bf16.mxu0 %v4001_v12 }
  0x46   : > { %3314 = vmatmul.mubr.f32.gmra.mrb[10].mxu0 %v229_v58 }
  0x47   : > { %3316 = vmatprep.mubr.msk.f32.mxu0 %vm4658_vm0, %v4659_v6  ;;  %4004 = vmatpush3.bf16.msra.mxu0 %v4001_v12 }
  0x48   : > { %4006 = vmatprep.subr.bf16.mxu0 %v4005_v16 }
  0x4a   : > { %3317 = vmatmul.mubr.f32.gmra.mrb[12].mxu0 %v230_v59  ;;  %v2790_v59 = vld [vmem:[%s5708_s2 + $0x190] sm:$0xff] }
  0x4b   : > { %3319 = vmatprep.mubr.msk.f32.mxu0 %vm4658_vm0, %v4659_v6  ;;  %4008 = vmatpush3.bf16.msra.mxu0 %v4005_v16  ;;  %v2794_v16 = vld [vmem:[%s5708_s2 + $0x1b0] sm:$0xff] }
  0x4c   : > { %4010 = vmatprep.subr.bf16.mxu0 %v4009_v24 }
  0x4e   : > { %3320 = vmatmul.mubr.f32.gmra.mrb[14].mxu0 %v231_v60  ;;  %v2791_v60 = vld [vmem:[%s5708_s2 + $0x198] sm:$0xff] }
  0x4f   : > { %3322 = vmatprep.mubr.msk.f32.mxu0 %vm4658_vm0, %v4659_v6  ;;  %4012 = vmatpush3.bf16.msra.mxu0 %v4009_v24 }
  0x50   : > { %4014 = vmatprep.subr.bf16.mxu0 %v4013_v35 }
  0x52   : > { %3323 = vmatmul.mubr.f32.gmra.mrb[16].mxu0 %v232_v61  ;;  %v4025_v61 = vpack.c.bf16 %v539_v55, %v538_v54  ;;  %v2802_v54 = vld [vmem:[%s5708_s2 + $0x1f0] sm:$0xff]  ;;  %v2803_v55 = vld [vmem:[%s5708_s2 + $0x1f8] sm:$0xff] }
  0x53   : > { %3325 = vmatprep.mubr.msk.f32.mxu0 %vm4658_vm0, %v4659_v6 }
  0x56   : > { %3326 = vmatmul.mubr.f32.gmra.mrb[18].mxu0 %v233_v62 }
  0x57   : > { %3328 = vmatprep.mubr.msk.f32.mxu0 %vm4658_vm0, %v4659_v6 }
  0x5a   : > { %3329 = vmatmul.mubr.f32.gmra.mrb[20].mxu0 %v234_v63  ;;  %v540_v63 = vld [vmem:[%s5708_s2 + $0x40] sm:$0xff] }
  0x5b   : > { %3331 = vmatprep.mubr.msk.f32.mxu0 %vm4658_vm0, %v4659_v6 }
  0x5e   : > { %3332 = vmatmul.mubr.f32.gmra.mrb[22].mxu0 %v235_v0  ;;  %v541_v0 = vld [vmem:[%s5708_s2 + $0x48] sm:$0xff] }
  0x5f   : > { %3334 = vmatprep.mubr.msk.f32.mxu0 %vm4658_vm0, %v4659_v6 }
  0x62   : > { %3335 = vmatmul.mubr.f32.gmra.mrb[24].mxu0 %v236_v1 }
  0x63   : > { %3337 = vmatprep.mubr.msk.f32.mxu0 %vm4658_vm0, %v4659_v6 }
  0x66   : > { %3338 = vmatmul.mubr.f32.gmra.mrb[26].mxu0 %v237_v2 }
  0x67   : > { %3340 = vmatprep.mubr.msk.f32.mxu0 %vm4658_vm0, %v4659_v6 }
  0x6a   : > { %3341 = vmatmul.mubr.f32.gmra.mrb[28].mxu0 %v238_v3 }
  0x6b   : > { %3343 = vmatprep.mubr.msk.f32.mxu0 %vm4658_vm0, %v4659_v6 }
  0x6e   : > { %3344 = vmatmul.mubr.f32.gmra.mrb[30].mxu0 %v239_v4  ;;  %v4081_v4 = vpack.c.bf16 %v2791_v60, %v2790_v59  ;;  %v4105_v59 = vpack.c.bf16 %v2803_v55, %v2802_v54  ;;  %v2875_v54 = vld [vmem:[%s5708_s2 + $0x438] sm:$0xff] }
  0x6f   : > { %3346 = vmatprep.mubr.msk.f32.mxu0 %vm4658_vm0, %v4659_v6 }
  0x72   : > { %3347 = vmatmul.mubr.f32.gmra.mrb[32].mxu0 %v240_v5  ;;  %v2792_v5 = vld [vmem:[%s5708_s2 + $0x1a0] sm:$0xff] }
  0x73   : > { %3349 = vmatprep.mubr.msk.f32.mxu0 %vm4658_vm0, %v4659_v6 }
  0x76   : > { %3350 = vmatmul.mubr.f32.gmra.mrb[34].mxu0 %v241_v7  ;;  %v2793_v7 = vld [vmem:[%s5708_s2 + $0x1a8] sm:$0xff] }
  0x77   : > { %3352 = vmatprep.mubr.msk.f32.mxu0 %vm4658_vm0, %v4659_v6  ;;  %v4085_v15 = vpack.c.bf16 %v2793_v7, %v2792_v5 }
  0x7a   : > { %3353 = vmatmul.mubr.f32.gmra.mrb[36].mxu0 %v242_v8  ;;  %v4029_v8 = vpack.c.bf16 %v541_v0, %v540_v63 }
  0x7b   : > { %3355 = vmatprep.mubr.msk.f32.mxu0 %vm4658_vm0, %v4659_v6 }
  0x7e   : > { %3356 = vmatmul.mubr.f32.gmra.mrb[38].mxu0 %v243_v9 }
  0x7f   : > { %3358 = vmatprep.mubr.msk.f32.mxu0 %vm4658_vm0, %v4659_v6 }
  0x82   : > { %3359 = vmatmul.mubr.f32.gmra.mrb[40].mxu0 %v244_v13 }
  0x83   : > { %3361 = vmatprep.mubr.msk.f32.mxu0 %vm4658_vm0, %v4659_v6 }
  0x86   : > { %3362 = vmatmul.mubr.f32.gmra.mrb[42].mxu0 %v245_v17  ;;  %v2795_v17 = vld [vmem:[%s5708_s2 + $0x1b8] sm:$0xff] }
  0x87   : > { %3364 = vmatprep.mubr.msk.f32.mxu0 %vm4658_vm0, %v4659_v6  ;;  %v2784_v6 = vld [vmem:[%s5708_s2 + $0x160] sm:$0xff]  ;;  %v4089_v25 = vpack.c.bf16 %v2795_v17, %v2794_v16 }
  0x88   : > { %v4069_v29 = vpack.c.bf16 %v2785_v28, %v2784_v6  ;;  %v4037_v6 = vpack.c.bf16 %v545_v21, %v544_v20 }
  0x8a   : > { %3365 = vmatmul.mubr.f32.gmra.mrb[44].mxu0 %v246_v23  ;;  %4070 = vmatprep.subr.bf16.mxu1 %v4069_v29 }
  0x8b   : > { %4072 = vmatpush3.bf16.msra.mxu1 %v4069_v29  ;;  %v546_v29 = vld [vmem:[%s5708_s2 + $0x70] sm:$0xff] }
  0x8c   : > { %4074 = vmatprep.subr.bf16.mxu1 %v4073_v32  ;;  %v4041_v37 = vpack.c.bf16 %v547_v30, %v546_v29  ;;  %v2870_v30 = vld [vmem:[%s5708_s2 + $0x410] sm:$0xff] }
  0x8f   : > { %4076 = vmatpush3.bf16.msra.mxu1 %v4073_v32 }
  0x90   : > { %4078 = vmatprep.subr.bf16.mxu1 %v4077_v38 }
 0x105   : > { %v329_v39 = vpop.f32.mrb[0].mxu0 }
 0x106   : > { %v443_v40 = vmax.f32 %v329_v39, 0.0  ;;  %v3300_v41 = vpop.f32.mrb[1].mxu0  ;;  %v2868_v39 = vld [vmem:[%s5708_s2 + $0x400] sm:$0xff] }
 0x108   : > { %491 = vst [vmem:[#allocation2 + $0x1] sm:$0xff] %v443_v40  ;;  %3399 = vmatprep.mubr.f32.mxu0 %v443_v40  ;;  %v2869_v40 = vld [vmem:[%s5708_s2 + $0x408] sm:$0xff] }
 0x109   : > { %v334_v44 = vpop.f32.mrb[2].mxu0 }
 0x10a   : > { %v444_v45 = vmax.f32 %v334_v44, 0.0  ;;  %v3303_v46 = vpop.f32.mrb[3].mxu0 }
 0x10c   : > { %492 = vst [vmem:[#allocation2 + $0x9] sm:$0xff] %v444_v45  ;;  %3400 = vmatmul.mubr.f32.vlgmr.msra.gmra.mrb[46].mxu0 %v444_v45  ;;  %v5113_v45 = vpack.c.bf16 %v2869_v40, %v2868_v39 }
 0x10d   : > { %v339_v50 = vpop.f32.mrb[4].mxu0  ;;  %4016 = vmatpush3.bf16.msra.mxu0 %v4013_v35  ;;  %v2798_v35 = vld [vmem:[%s5708_s2 + $0x1d0] sm:$0xff] }
 0x10e   : > { %v445_v51 = vmax.f32 %v339_v50, 0.0  ;;  %v3306_v52 = vpop.f32.mrb[5].mxu0  ;;  %4018 = vmatprep.subr.bf16.mxu0 %v4017_v47  ;;  %v4097_v44 = vpack.c.bf16 %v2799_v36, %v2798_v35 }
 0x110   : > { %493 = vst [vmem:[#allocation2 + $0x11] sm:$0xff] %v445_v51  ;;  %3402 = vmatprep.mubr.f32.mxu0 %v445_v51 }
 0x111   : > { %v344_v56 = vpop.f32.mrb[6].mxu0  ;;  %4020 = vmatpush3.bf16.msra.mxu0 %v4017_v47  ;;  %v2800_v47 = vld [vmem:[%s5708_s2 + $0x1e0] sm:$0xff] }
 0x112   : > { %v446_v57 = vmax.f32 %v344_v56, 0.0  ;;  %v3309_v58 = vpop.f32.mrb[7].mxu0  ;;  %4022 = vmatprep.subr.bf16.mxu0 %v4021_v53  ;;  %v4101_v52 = vpack.c.bf16 %v2801_v48, %v2800_v47 }
 0x113   : > { %v893_v62 = vld [vmem:[#allocation2 + $0x2] sm:$0xff] }
 0x114   : > { %494 = vst [vmem:[#allocation2 + $0x19] sm:$0xff] %v446_v57  ;;  %3517 = vmatprep.mubr.f32.mxu1 %v893_v62  ;;  %3403 = vmatmul.mubr.f32.gmra.mrb[48].mxu0 %v446_v57  ;;  %v2805_v62 = vld [vmem:[%s5708_s2 + $0x208] sm:$0xff] }
 0x115   : > { %v349_v1 = vpop.f32.mrb[8].mxu0  ;;  %4024 = vmatpush3.bf16.msra.mxu0 %v4021_v53  ;;  %v515_v40 = vld [vmem:[#allocation2 + $0x8] sm:$0xff] }
 0x116   : > { %v447_v2 = vmax.f32 %v349_v1, 0.0  ;;  %v3312_v3 = vpop.f32.mrb[9].mxu0  ;;  %4026 = vmatprep.subr.bf16.mxu0 %v4025_v61 }
 0x117   : > { %v894_v9 = vld [vmem:[#allocation2 + $0xa] sm:$0xff] }
 0x118   : > { %495 = vst [vmem:[#allocation2 + $0x21] sm:$0xff] %v447_v2  ;;  %3518 = vmatmul.mubr.f32.vlgmr.msra.gmra.mrb[0].mxu1 %v894_v9  ;;  %3405 = vmatprep.mubr.f32.mxu0 %v447_v2 }
 0x119   : > { %v354_v12 = vpop.f32.mrb[10].mxu0  ;;  %4080 = vmatpush3.bf16.msra.mxu1 %v4077_v38  ;;  %4028 = vmatpush3.bf16.msra.mxu0 %v4025_v61  ;;  %v2804_v61 = vld [vmem:[%s5708_s2 + $0x200] sm:$0xff] }
 0x11a   : > { %v448_v13 = vmax.f32 %v354_v12, 0.0  ;;  %v3315_v14 = vpop.f32.mrb[11].mxu0  ;;  %4082 = vmatprep.subr.bf16.mxu1 %v4081_v4  ;;  %4030 = vmatprep.subr.bf16.mxu0 %v4029_v8  ;;  %v5143_v2 = vpack.c.bf16 %v2805_v62, %v2804_v61  ;;  %v2807_v62 = vld [vmem:[%s5708_s2 + $0x218] sm:$0xff] }
 0x11b   : > { %v5074_v19 = vld [vmem:[#allocation2 + $0x12] sm:$0xff] }
 0x11c   : > { %496 = vst [vmem:[#allocation2 + $0x29] sm:$0xff] %v448_v13  ;;  %3520 = vmatprep.mubr.f32.mxu1 %v5074_v19  ;;  %3406 = vmatmul.mubr.f32.gmra.mrb[50].mxu0 %v448_v13 }
 0x11d   : > { %v359_v22 = vpop.f32.mrb[12].mxu0  ;;  %4084 = vmatpush3.bf16.msra.mxu1 %v4081_v4  ;;  %4032 = vmatpush3.bf16.msra.mxu0 %v4029_v8 }
 0x11e   : > { %v449_v23 = vmax.f32 %v359_v22, 0.0  ;;  %v3318_v24 = vpop.f32.mrb[13].mxu0  ;;  %4086 = vmatprep.subr.bf16.mxu1 %v4085_v15  ;;  %4034 = vmatprep.subr.bf16.mxu0 %v4033_v18 }
 0x11f   : > { %v5089_v28 = vld [vmem:[#allocation2 + $0x1a] sm:$0xff] }
 0x120   : > { %497 = vst [vmem:[#allocation2 + $0x31] sm:$0xff] %v449_v23  ;;  %3521 = vmatmul.mubr.f32.gmra.mrb[2].mxu1 %v5089_v28  ;;  %3408 = vmatprep.mubr.f32.mxu0 %v449_v23 }
 0x121   : > { %v364_v31 = vpop.f32.mrb[14].mxu0  ;;  %4088 = vmatpush3.bf16.msra.mxu1 %v4085_v15  ;;  %4036 = vmatpush3.bf16.msra.mxu0 %v4033_v18 }
 0x122   : > { %v450_v32 = vmax.f32 %v364_v31, 0.0  ;;  %v3321_v33 = vpop.f32.mrb[15].mxu0  ;;  %4090 = vmatprep.subr.bf16.mxu1 %v4089_v25  ;;  %4038 = vmatprep.subr.bf16.mxu0 %v4037_v6  ;;  %v2871_v31 = vld [vmem:[%s5708_s2 + $0x418] sm:$0xff] }
 0x123   : > { %v5104_v38 = vld [vmem:[#allocation2 + $0x22] sm:$0xff]  ;;  %v5173_v36 = vpack.c.bf16 %v2871_v31, %v2870_v30 }
 0x124   : > { %498 = vst [vmem:[#allocation2 + $0x39] sm:$0xff] %v450_v32  ;;  %3523 = vmatprep.mubr.f32.mxu1 %v5104_v38  ;;  %3409 = vmatmul.mubr.f32.gmra.mrb[52].mxu0 %v450_v32  ;;  %v514_v32 = vld [vmem:[#allocation2] sm:$0xff]  ;;  %v519_v61 = vld [vmem:[#allocation2 + $0x28] sm:$0xff] }
 0x125   : > { %v369_v41 = vpop.f32.mrb[16].mxu0  ;;  %4092 = vmatpush3.bf16.msra.mxu1 %v4089_v25  ;;  %4040 = vmatpush3.bf16.msra.mxu0 %v4037_v6 }
 0x126   : > { %v451_v42 = vmax.f32 %v369_v41, 0.0  ;;  %v3324_v43 = vpop.f32.mrb[17].mxu0  ;;  %4094 = vmatprep.subr.bf16.mxu1 %v4093_v34  ;;  %4042 = vmatprep.subr.bf16.mxu0 %v4041_v37  ;;  %v2873_v41 = vld [vmem:[%s5708_s2 + $0x428] sm:$0xff] }
 0x127   : > { %v5115_v46 = vld [vmem:[#allocation2 + $0x2a] sm:$0xff] }
 0x128   : > { %499 = vst [vmem:[#allocation2 + $0x41] sm:$0xff] %v451_v42  ;;  %3524 = vmatmul.mubr.f32.gmra.mrb[4].mxu1 %v5115_v46  ;;  %3411 = vmatprep.mubr.f32.mxu0 %v451_v42  ;;  %v516_v42 = vld [vmem:[#allocation2 + $0x10] sm:$0xff] }
 0x129   : > { %v374_v49 = vpop.f32.mrb[18].mxu0  ;;  %4096 = vmatpush3.bf16.msra.mxu1 %v4093_v34  ;;  %4044 = vmatpush3.bf16.msra.mxu0 %v4041_v37  ;;  %v2872_v37 = vld [vmem:[%s5708_s2 + $0x420] sm:$0xff] }
 0x12a   : > { %v452_v50 = vmax.f32 %v374_v49, 0.0  ;;  %v3327_v51 = vpop.f32.mrb[19].mxu0  ;;  %4098 = vmatprep.subr.bf16.mxu1 %v4097_v44  ;;  %4238 = vmatprep.subr.bf16.mxu0 %v5113_v45  ;;  %v5186_v47 = vpack.c.bf16 %v2873_v41, %v2872_v37 }
 0x12b   : > { %v5125_v53 = vld [vmem:[#allocation2 + $0x32] sm:$0xff]  ;;  %v518_v51 = vld [vmem:[#allocation2 + $0x20] sm:$0xff] }
 0x12c   : > { %500 = vst [vmem:[#allocation2 + $0x49] sm:$0xff] %v452_v50  ;;  %3526 = vmatprep.mubr.f32.mxu1 %v5125_v53  ;;  %3412 = vmatmul.mubr.f32.gmra.mrb[54].mxu0 %v452_v50  ;;  %v517_v50 = vld [vmem:[#allocation2 + $0x18] sm:$0xff] }
 0x12d   : > { %v379_v56 = vpop.f32.mrb[20].mxu0  ;;  %4100 = vmatpush3.bf16.msra.mxu1 %v4097_v44 }
 0x12e   : > { %v453_v57 = vmax.f32 %v379_v56, 0.0  ;;  %v3330_v58 = vpop.f32.mrb[21].mxu0  ;;  %4102 = vmatprep.subr.bf16.mxu1 %v4101_v52  ;;  %v2806_v56 = vld [vmem:[%s5708_s2 + $0x210] sm:$0xff] }
 0x12f   : > { %v5134_v60 = vld [vmem:[#allocation2 + $0x3a] sm:$0xff] }
 0x130   : > { %501 = vst [vmem:[#allocation2 + $0x51] sm:$0xff] %v453_v57  ;;  %3527 = vmatmul.mubr.f32.gmra.mrb[6].mxu1 %v5134_v60  ;;  %3414 = vmatprep.mubr.f32.mxu0 %v453_v57 }
 0x131   : > { %v384_v63 = vpop.f32.mrb[22].mxu0  ;;  %4104 = vmatpush3.bf16.msra.mxu1 %v4101_v52  ;;  %v2874_v52 = vld [vmem:[%s5708_s2 + $0x430] sm:$0xff] }
 0x132   : > { %v454_v0 = vmax.f32 %v384_v63, 0.0  ;;  %v3333_v1 = vpop.f32.mrb[23].mxu0  ;;  %4106 = vmatprep.subr.bf16.mxu1 %v4105_v59  ;;  %v5207_v63 = vpack.c.bf16 %v2875_v54, %v2874_v52  ;;  %v2818_v54 = vld [vmem:[%s5708_s2 + $0x270] sm:$0xff] }
 0x133   : > { %v5145_v3 = vld [vmem:[#allocation2 + $0x42] sm:$0xff] }
 0x134   : > { %502 = vst [vmem:[#allocation2 + $0x59] sm:$0xff] %v454_v0  ;;  %3529 = vmatprep.mubr.f32.mxu1 %v5145_v3  ;;  %3415 = vmatmul.mubr.f32.gmra.mrb[56].mxu0 %v454_v0  ;;  %v520_v0 = vld [vmem:[#allocation2 + $0x30] sm:$0xff] }
 0x135   : > { %v389_v4 = vpop.f32.mrb[24].mxu0  ;;  %4108 = vmatpush3.bf16.msra.mxu1 %v4105_v59 }
 0x136   : > { %v455_v5 = vmax.f32 %v389_v4, 0.0  ;;  %v3336_v7 = vpop.f32.mrb[25].mxu0  ;;  %4110 = vmatprep.subr.bf16.mxu1 %v5143_v2  ;;  %v4113_v4 = vpack.c.bf16 %v2807_v62, %v2806_v56  ;;  %v2820_v56 = vld [vmem:[%s5708_s2 + $0x280] sm:$0xff] }
 0x137   : > { %v5149_v8 = vld [vmem:[#allocation2 + $0x4a] sm:$0xff]  ;;  %v2144_v62 = vld [vmem:[#allocation2 + $0x3e] sm:$0xff] }
 0x138   : > { %503 = vst [vmem:[#allocation2 + $0x61] sm:$0xff] %v455_v5  ;;  %3530 = vmatmul.mubr.f32.gmra.mrb[8].mxu1 %v5149_v8  ;;  %3417 = vmatprep.mubr.f32.mxu0 %v455_v5 }
 0x139   : > { %v394_v9 = vpop.f32.mrb[26].mxu0 }
 0x13a   : > { %v456_v10 = vmax.f32 %v394_v9, 0.0  ;;  %v3339_v11 = vpop.f32.mrb[27].mxu0  ;;  %v521_v9 = vld [vmem:[#allocation2 + $0x38] sm:$0xff] }
 0x13b   : > { %v5152_v12 = vld [vmem:[#allocation2 + $0x52] sm:$0xff]  ;;  %v2809_v11 = vld [vmem:[%s5708_s2 + $0x228] sm:$0xff] }
 0x13c   : > { %504 = vst [vmem:[#allocation2 + $0x69] sm:$0xff] %v456_v10  ;;  %3532 = vmatprep.mubr.f32.mxu1 %v5152_v12  ;;  %3418 = vmatmul.mubr.f32.gmra.mrb[58].mxu0 %v456_v10  ;;  %v2808_v10 = vld [vmem:[%s5708_s2 + $0x220] sm:$0xff] }
 0x13d   : > { %v399_v13 = vpop.f32.mrb[28].mxu0 }
 0x13e   : > { %v457_v14 = vmax.f32 %v399_v13, 0.0  ;;  %v3342_v15 = vpop.f32.mrb[29].mxu0  ;;  %v2877_v13 = vld [vmem:[%s5708_s2 + $0x448] sm:$0xff] }
 0x13f   : > { %v5155_v16 = vld [vmem:[#allocation2 + $0x5a] sm:$0xff] }
 0x140   : > { %505 = vst [vmem:[#allocation2 + $0x71] sm:$0xff] %v457_v14  ;;  %3533 = vmatmul.mubr.f32.gmra.mrb[10].mxu1 %v5155_v16  ;;  %3420 = vmatprep.mubr.f32.mxu0 %v457_v14  ;;  %v522_v14 = vld [vmem:[#allocation2 + $0x40] sm:$0xff] }
 0x141   : > { %v404_v17 = vpop.f32.mrb[30].mxu0  ;;  %v526_v30 = vld [vmem:[#allocation2 + $0x60] sm:$0xff] }
 0x142   : > { %v458_v18 = vmax.f32 %v404_v17, 0.0  ;;  %v3345_v20 = vpop.f32.mrb[31].mxu0  ;;  %v4117_v17 = vpack.c.bf16 %v2809_v11, %v2808_v10  ;;  %v2824_v10 = vld [vmem:[%s5708_s2 + $0x2a0] sm:$0xff]  ;;  %v2825_v11 = vld [vmem:[%s5708_s2 + $0x2a8] sm:$0xff] }
 0x143   : > { %v5158_v21 = vld [vmem:[#allocation2 + $0x62] sm:$0xff] }
 0x144   : > { %506 = vst [vmem:[#allocation2 + $0x79] sm:$0xff] %v458_v18  ;;  %3535 = vmatprep.mubr.f32.mxu1 %v5158_v21  ;;  %3421 = vmatmul.mubr.f32.gmra.mrb[60].mxu0 %v458_v18  ;;  %v523_v20 = vld [vmem:[#allocation2 + $0x48] sm:$0xff] }
 0x145   : > { %v409_v22 = vpop.f32.mrb[32].mxu0 }
 0x146   : > { %v459_v23 = vmax.f32 %v409_v22, 0.0  ;;  %v3348_v24 = vpop.f32.mrb[33].mxu0  ;;  %v2810_v22 = vld [vmem:[%s5708_s2 + $0x230] sm:$0xff] }
 0x147   : > { %v5161_v25 = vld [vmem:[#allocation2 + $0x6a] sm:$0xff] }
 0x148   : > { %507 = vst [vmem:[#allocation2 + $0x81] sm:$0xff] %v459_v23  ;;  %3536 = vmatmul.mubr.f32.gmra.mrb[12].mxu1 %v5161_v25  ;;  %3423 = vmatprep.mubr.f32.mxu0 %v459_v23  ;;  %v2811_v23 = vld [vmem:[%s5708_s2 + $0x238] sm:$0xff]  ;;  %v528_v37 = vld [vmem:[#allocation2 + $0x70] sm:$0xff] }
 0x149   : > { %v414_v26 = vpop.f32.mrb[34].mxu0  ;;  %v4121_v24 = vpack.c.bf16 %v2811_v23, %v2810_v22  ;;  %v2150_v22 = vld [vmem:[#allocation2 + $0x6e] sm:$0xff] }
 0x14a   : > { %v460_v27 = vmax.f32 %v414_v26, 0.0  ;;  %v3351_v6 = vpop.f32.mrb[35].mxu0  ;;  %v2878_v26 = vld [vmem:[%s5708_s2 + $0x450] sm:$0xff] }
 0x14b   : > { %v5164_v29 = vld [vmem:[#allocation2 + $0x72] sm:$0xff] }
 0x14c   : > { %508 = vst [vmem:[#allocation2 + $0x89] sm:$0xff] %v460_v27  ;;  %3538 = vmatprep.mubr.f32.mxu1 %v5164_v29  ;;  %3424 = vmatmul.mubr.f32.gmra.mrb[62].mxu0 %v460_v27  ;;  %v2879_v27 = vld [vmem:[%s5708_s2 + $0x458] sm:$0xff] }
 0x14d   : > { %v419_v33 = vpop.f32.mrb[36].mxu0  ;;  %3458 = vmatprep.mubr.f32.mxu0 %v514_v32  ;;  %v525_v6 = vld [vmem:[#allocation2 + $0x58] sm:$0xff]  ;;  %v5254_v32 = vpack.c.bf16 %v2879_v27, %v2878_v26  ;;  %v2828_v26 = vld [vmem:[%s5708_s2 + $0x2c0] sm:$0xff]  ;;  %v2829_v27 = vld [vmem:[%s5708_s2 + $0x2c8] sm:$0xff] }
 0x14e   : > { %v461_v34 = vmax.f32 %v419_v33, 0.0  ;;  %v3354_v35 = vpop.f32.mrb[37].mxu0  ;;  %v2880_v33 = vld [vmem:[%s5708_s2 + $0x460] sm:$0xff] }
 0x14f   : > { %v5178_v39 = vld [vmem:[#allocation2 + $0x7a] sm:$0xff] }
 0x150   : > { %509 = vst [vmem:[#allocation2 + $0x91] sm:$0xff] %v461_v34  ;;  %3539 = vmatmul.mubr.f32.gmra.mrb[14].mxu1 %v5178_v39  ;;  %3459 = vmatmul.mubr.f32.vlgmr.msra.gmra.mrb[46].mxu0 %v515_v40  ;;  %v2881_v34 = vld [vmem:[%s5708_s2 + $0x468] sm:$0xff]  ;;  %v2815_v35 = vld [vmem:[%s5708_s2 + $0x258] sm:$0xff] }
 0x151   : > { %v424_v43 = vpop.f32.mrb[38].mxu0  ;;  %3461 = vmatprep.mubr.f32.mxu0 %v516_v42  ;;  %4240 = vmatpush3.bf16.msra.mxu0 %v5113_v45  ;;  %v5272_v41 = vpack.c.bf16 %v2881_v34, %v2880_v33  ;;  %v2882_v42 = vld [vmem:[%s5708_s2 + $0x470] sm:$0xff]  ;;  %v2831_v34 = vld [vmem:[%s5708_s2 + $0x2d8] sm:$0xff] }
 0x152   : > { %v462_v44 = vmax.f32 %v424_v43, 0.0  ;;  %4242 = vmatprep.subr.bf16.mxu0 %v5173_v36  ;;  %v3357_v48 = vpop.f32.mrb[39].mxu0  ;;  %v2883_v43 = vld [vmem:[%s5708_s2 + $0x478] sm:$0xff]  ;;  %v2830_v33 = vld [vmem:[%s5708_s2 + $0x2d0] sm:$0xff] }
 0x153   : > { %v5188_v49 = vld [vmem:[#allocation2 + $0x82] sm:$0xff] }
 0x154   : > { %510 = vst [vmem:[#allocation2 + $0x99] sm:$0xff] %v462_v44  ;;  %3541 = vmatprep.mubr.f32.mxu1 %v5188_v49  ;;  %3462 = vmatmul.mubr.f32.gmra.mrb[48].mxu0 %v517_v50  ;;  %v2817_v44 = vld [vmem:[%s5708_s2 + $0x268] sm:$0xff]  ;;  %v530_v48 = vld [vmem:[#allocation2 + $0x80] sm:$0xff] }
 0x155   : > { %3464 = vmatprep.mubr.f32.mxu0 %v518_v51  ;;  %4244 = vmatpush3.bf16.msra.mxu0 %v5173_v36  ;;  %v429_v55 = vpop.f32.mrb[40].mxu0  ;;  %v5290_v51 = vpack.c.bf16 %v2883_v43, %v2882_v42  ;;  %v531_v52 = vld [vmem:[#allocation2 + $0x88] sm:$0xff]  ;;  %v2832_v42 = vld [vmem:[%s5708_s2 + $0x2e0] sm:$0xff] }
 0x156   : > { %4246 = vmatprep.subr.bf16.mxu0 %v5186_v47  ;;  %v463_v57 = vmax.f32 %v429_v55, 0.0  ;;  %v3360_v58 = vpop.f32.mrb[41].mxu0  ;;  %v2833_v43 = vld [vmem:[%s5708_s2 + $0x2e8] sm:$0xff] }
 0x157   : > { %v5202_v59 = vld [vmem:[#allocation2 + $0x8a] sm:$0xff] }
 0x158   : > { %3542 = vmatmul.mubr.f32.gmra.mrb[16].mxu1 %v5202_v59  ;;  %3465 = vmatmul.mubr.f32.gmra.mrb[50].mxu0 %v519_v61  ;;  %511 = vst [vmem:[#allocation2 + $0xa1] sm:$0xff] %v463_v57  ;;  %v2143_v57 = vld [vmem:[#allocation2 + $0x36] sm:$0xff] }
 0x159   : > { %3576 = vmatprep.mubr.f32.mxu1 %v5074_v19  ;;  %3467 = vmatprep.mubr.f32.mxu0 %v520_v0  ;;  %v434_v1 = vpop.f32.mrb[42].mxu0  ;;  %v2876_v19 = vld [vmem:[%s5708_s2 + $0x440] sm:$0xff] }
 0x15a   : > { %4248 = vmatpush3.bf16.msra.mxu0 %v5186_v47  ;;  %v464_v5 = vmax.f32 %v434_v1, 0.0  ;;  %v3363_v7 = vpop.f32.mrb[43].mxu0  ;;  %v2145_v0 = vld [vmem:[#allocation2 + $0x46] sm:$0xff] }
 0x15b   : > { %4250 = vmatprep.subr.bf16.mxu0 %v5207_v63  ;;  %v1117_v61 = vld [vmem:[#allocation2 + $0x92] sm:$0xff] }
 0x15c   : > { %3577 = vmatmul.mubr.f32.vlgmr.msra.gmra.mrb[0].mxu1 %v5089_v28  ;;  %3468 = vmatmul.mubr.f32.gmra.mrb[52].mxu0 %v521_v9  ;;  %512 = vst [vmem:[#allocation2 + $0xa9] sm:$0xff] %v464_v5  ;;  %v2147_v7 = vld [vmem:[#allocation2 + $0x56] sm:$0xff] }
 0x15d   : > { %4112 = vmatpush3.bf16.msra.mxu1 %v5143_v2  ;;  %3579 = vmatprep.mubr.f32.mxu1 %v5104_v38  ;;  %v439_v15 = vpop.f32.mrb[44].mxu0  ;;  %v5235_v2 = vpack.c.bf16 %v2877_v13, %v2876_v19  ;;  %v524_v38 = vld [vmem:[#allocation2 + $0x50] sm:$0xff]  ;;  %v1310_v9 = vld [vmem:[#allocation2 + $0x1b] sm:$0xff]  ;;  %v1311_v19 = vld [vmem:[#allocation2 + $0x23] sm:$0xff] }
 0x15e   : > { %4114 = vmatprep.subr.bf16.mxu1 %v4113_v4  ;;  %3470 = vmatprep.mubr.f32.mxu0 %v522_v14  ;;  %v465_v28 = vmax.f32 %v439_v15, 0.0  ;;  %v3366_v18 = vpop.f32.mrb[45].mxu0  ;;  %v2148_v13 = vld [vmem:[#allocation2 + $0x5e] sm:$0xff]  ;;  %v4149_v14 = vpack.c.bf16 %v2825_v11, %v2824_v10  ;;  %v2149_v15 = vld [vmem:[#allocation2 + $0x66] sm:$0xff]  ;;  %v2842_v10 = vld [vmem:[%s5708_s2 + $0x330] sm:$0xff] }
 0x15f   : > { %4252 = vmatpush3.bf16.msra.mxu0 %v5207_v63  ;;  %v1118_v1 = vld [vmem:[#allocation2 + $0x9a] sm:$0xff] }
 0x160   : > { %3580 = vmatmul.mubr.f32.gmra.mrb[2].mxu1 %v5115_v46  ;;  %3471 = vmatmul.mubr.f32.gmra.mrb[54].mxu0 %v523_v20  ;;  %513 = vst [vmem:[#allocation2 + $0xb1] sm:$0xf] %v465_v28  ;;  %v2812_v46 = vld [vmem:[%s5708_s2 + $0x240] sm:$0xff]  ;;  %v2826_v28 = vld [vmem:[%s5708_s2 + $0x2b0] sm:$0xff]  ;;  %v2827_v18 = vld [vmem:[%s5708_s2 + $0x2b8] sm:$0xff] }
 0x161   : > { %3582 = vmatprep.mubr.f32.mxu1 %v5125_v53  ;;  %4116 = vmatpush3.bf16.msra.mxu1 %v4113_v4  ;;  %v2813_v53 = vld [vmem:[%s5708_s2 + $0x248] sm:$0xff]  ;;  %v1309_v4 = vld [vmem:[#allocation2 + $0x13] sm:$0xff]  ;;  %v4153_v23 = vpack.c.bf16 %v2827_v18, %v2826_v28 }
 0x162   : > { %4118 = vmatprep.subr.bf16.mxu1 %v4117_v17  ;;  %3473 = vmatprep.mubr.f32.mxu0 %v524_v38  ;;  %v4125_v31 = vpack.c.bf16 %v2813_v53, %v2812_v46  ;;  %v1313_v20 = vld [vmem:[#allocation2 + $0x33] sm:$0xff]  ;;  %v2152_v46 = vld [vmem:[#allocation2 + $0x7e] sm:$0xff]  ;;  %v4157_v53 = vpack.c.bf16 %v2829_v27, %v2828_v26 }
 0x163   : > { %4254 = vmatprep.subr.bf16.mxu0 %v5235_v2  ;;  %v2151_v38 = vld [vmem:[#allocation2 + $0x76] sm:$0xff]  ;;  %v1523_v28 = vld [vmem:[#allocation2 + $0x44] sm:$0xff] }
 0x164   : > { %3583 = vmatmul.mubr.f32.gmra.mrb[4].mxu1 %v5134_v60  ;;  %3474 = vmatmul.mubr.f32.gmra.mrb[56].mxu0 %v525_v6  ;;  %v527_v60 = vld [vmem:[#allocation2 + $0x68] sm:$0xff]  ;;  %v2843_v11 = vld [vmem:[%s5708_s2 + $0x338] sm:$0xff]  ;;  %v2848_v27 = vld [vmem:[%s5708_s2 + $0x360] sm:$0xff] }
 0x165   : > { %3585 = vmatprep.mubr.f32.mxu1 %v5145_v3  ;;  %4120 = vmatpush3.bf16.msra.mxu1 %v4117_v17  ;;  %v2814_v3 = vld [vmem:[%s5708_s2 + $0x250] sm:$0xff]  ;;  %v1315_v6 = vld [vmem:[#allocation2 + $0x43] sm:$0xff] }
 0x166   : > { %4122 = vmatprep.subr.bf16.mxu1 %v4121_v24  ;;  %3476 = vmatprep.mubr.f32.mxu0 %v526_v30  ;;  %v4129_v40 = vpack.c.bf16 %v2815_v35, %v2814_v3  ;;  %v1312_v17 = vld [vmem:[#allocation2 + $0x2b] sm:$0xff]  ;;  %v2155_v35 = vld [vmem:[#allocation2 + $0x96] sm:$0xff] }
 0x167   : > { %4256 = vmatpush3.bf16.msra.mxu0 %v5235_v2  ;;  %v2153_v30 = vld [vmem:[#allocation2 + $0x86] sm:$0xff]  ;;  %v2154_v3 = vld [vmem:[#allocation2 + $0x8e] sm:$0xff]  ;;  %v1526_v26 = vld [vmem:[#allocation2 + $0x5c] sm:$0xff] }
 0x168   : > { %3586 = vmatmul.mubr.f32.gmra.mrb[6].mxu1 %v5149_v8  ;;  %3477 = vmatmul.mubr.f32.gmra.mrb[58].mxu0 %v527_v60  ;;  %v529_v8 = vld [vmem:[#allocation2 + $0x78] sm:$0xff] }
 0x169   : > { %3588 = vmatprep.mubr.f32.mxu1 %v5152_v12  ;;  %4124 = vmatpush3.bf16.msra.mxu1 %v4121_v24  ;;  %v2816_v12 = vld [vmem:[%s5708_s2 + $0x260] sm:$0xff]  ;;  %v1317_v60 = vld [vmem:[#allocation2 + $0x53] sm:$0xff] }
 0x16a   : > { %4126 = vmatprep.subr.bf16.mxu1 %v4125_v31  ;;  %4258 = vmatprep.subr.bf16.mxu0 %v5254_v32  ;;  %v4133_v50 = vpack.c.bf16 %v2817_v44, %v2816_v12  ;;  %v1314_v24 = vld [vmem:[#allocation2 + $0x3b] sm:$0xff]  ;;  %v4165_v44 = vpack.c.bf16 %v2833_v43, %v2832_v42  ;;  %v1532_v43 = vld [vmem:[#allocation2 + $0x8c] sm:$0xff] }
 0x16b   : > { %3479 = vmatprep.mubr.f32.mxu0 %v528_v37  ;;  %4260 = vmatpush3.bf16.msra.mxu0 %v5254_v32  ;;  %v4161_v37 = vpack.c.bf16 %v2831_v34, %v2830_v33  ;;  %v2156_v12 = vld [vmem:[#allocation2 + $0x9e] sm:$0xff]  ;;  %v1529_v34 = vld [vmem:[#allocation2 + $0x74] sm:$0xff] }
 0x16c   : > { %3589 = vmatmul.mubr.f32.gmra.mrb[8].mxu1 %v5155_v16  ;;  %3480 = vmatmul.mubr.f32.gmra.mrb[60].mxu0 %v529_v8  ;;  %v2819_v16 = vld [vmem:[%s5708_s2 + $0x278] sm:$0xff]  ;;  %v1319_v8 = vld [vmem:[#allocation2 + $0x63] sm:$0xff] }
 0x16d   : > { %3591 = vmatprep.mubr.f32.mxu1 %v5158_v21  ;;  %4128 = vmatpush3.bf16.msra.mxu1 %v4125_v31  ;;  %v2141_v21 = vld [vmem:[#allocation2 + $0x26] sm:$0xff]  ;;  %v4137_v55 = vpack.c.bf16 %v2819_v16, %v2818_v54  ;;  %v1321_v54 = vld [vmem:[#allocation2 + $0x73] sm:$0xff] }
 0x16e   : > { %4130 = vmatprep.subr.bf16.mxu1 %v4129_v40  ;;  %4262 = vmatprep.subr.bf16.mxu0 %v5272_v41  ;;  %v1316_v31 = vld [vmem:[#allocation2 + $0x4b] sm:$0xff]  ;;  %v2851_v33 = vld [vmem:[%s5708_s2 + $0x378] sm:$0xff] }
 0x16f   : > { %3482 = vmatprep.mubr.f32.mxu0 %v530_v48  ;;  %4264 = vmatpush3.bf16.msra.mxu0 %v5272_v41  ;;  %v1320_v48 = vld [vmem:[#allocation2 + $0x6b] sm:$0xff] }
 0x170   : > { %3592 = vmatmul.mubr.f32.gmra.mrb[10].mxu1 %v5161_v25  ;;  %3483 = vmatmul.mubr.f32.gmra.mrb[62].mxu0 %v531_v52  ;;  %v2821_v25 = vld [vmem:[%s5708_s2 + $0x288] sm:$0xff]  ;;  %v2835_v52 = vld [vmem:[%s5708_s2 + $0x2f8] sm:$0xff] }
 0x171   : > { %3594 = vmatprep.mubr.f32.mxu1 %v5164_v29  ;;  %4132 = vmatpush3.bf16.msra.mxu1 %v4129_v40  ;;  %v2142_v29 = vld [vmem:[#allocation2 + $0x2e] sm:$0xff]  ;;  %v4141_v58 = vpack.c.bf16 %v2821_v25, %v2820_v56  ;;  %v1318_v40 = vld [vmem:[#allocation2 + $0x5b] sm:$0xff]  ;;  %v1323_v25 = vld [vmem:[#allocation2 + $0x83] sm:$0xff] }
 0x172   : > { %4134 = vmatprep.subr.bf16.mxu1 %v4133_v50  ;;  %4266 = vmatprep.subr.bf16.mxu0 %v5290_v51  ;;  %v2837_v56 = vld [vmem:[%s5708_s2 + $0x308] sm:$0xff] }
 0x173   : > { %4268 = vmatpush3.bf16.msra.mxu0 %v5290_v51  ;;  %3871 = vmatprep.mubr.f32.mxu0 %v2141_v21  ;;  %v1322_v21 = vld [vmem:[#allocation2 + $0x7b] sm:$0xff] }
 0x174   : > { %3595 = vmatmul.mubr.f32.gmra.mrb[12].mxu1 %v5178_v39  ;;  %v2822_v39 = vld [vmem:[%s5708_s2 + $0x290] sm:$0xff] }
 0x175   : > { %3597 = vmatprep.mubr.f32.mxu1 %v5188_v49  ;;  %4136 = vmatpush3.bf16.msra.mxu1 %v4133_v50  ;;  %v2823_v49 = vld [vmem:[%s5708_s2 + $0x298] sm:$0xff]  ;;  %v2834_v50 = vld [vmem:[%s5708_s2 + $0x2f0] sm:$0xff] }
 0x176   : > { %4138 = vmatprep.subr.bf16.mxu1 %v4137_v55  ;;  %3872 = vmatmul.mubr.f32.vlgmr.msra.gmra.mrb[64].mxu0 %v2142_v29  ;;  %v4145_v5 = vpack.c.bf16 %v2823_v49, %v2822_v39  ;;  %v4169_v16 = vpack.c.bf16 %v2835_v52, %v2834_v50  ;;  %v1518_v49 = vld [vmem:[#allocation2 + $0x1c] sm:$0xff] }
 0x177   : > { %3874 = vmatprep.mubr.f32.mxu0 %v2143_v57  ;;  %v1324_v57 = vld [vmem:[#allocation2 + $0x8b] sm:$0xff]  ;;  %v2856_v52 = vld [vmem:[%s5708_s2 + $0x3a0] sm:$0xff] }
 0x178   : > { %3598 = vmatmul.mubr.f32.gmra.mrb[14].mxu1 %v5202_v59  ;;  %v2146_v59 = vld [vmem:[#allocation2 + $0x4e] sm:$0xff] }
 0x179   : > { %3600 = vmatprep.mubr.f32.mxu1 %v1117_v61  ;;  %4140 = vmatpush3.bf16.msra.mxu1 %v4137_v55  ;;  %v2836_v55 = vld [vmem:[%s5708_s2 + $0x300] sm:$0xff] }
 0x17a   : > { %4142 = vmatprep.subr.bf16.mxu1 %v4141_v58  ;;  %3875 = vmatmul.mubr.f32.gmra.mrb[66].mxu0 %v2144_v62  ;;  %v4173_v29 = vpack.c.bf16 %v2837_v56, %v2836_v55  ;;  %v1326_v61 = vld [vmem:[#allocation2 + $0x9b] sm:$0xff]  ;;  %v2838_v62 = vld [vmem:[%s5708_s2 + $0x310] sm:$0xff] }
 0x17b   : > { %3877 = vmatprep.mubr.f32.mxu0 %v2145_v0  ;;  %v2839_v0 = vld [vmem:[%s5708_s2 + $0x318] sm:$0xff] }
 0x17c   : > { %3601 = vmatmul.mubr.f32.gmra.mrb[16].mxu1 %v1118_v1  ;;  %v1517_v1 = vld [vmem:[#allocation2 + $0x14] sm:$0xff]  ;;  %v4177_v39 = vpack.c.bf16 %v2839_v0, %v2838_v62  ;;  %v2864_v0 = vld [vmem:[%s5708_s2 + $0x3e0] sm:$0xff] }
 0x17d   : > { %3635 = vmatprep.mubr.f32.mxu1 %v1309_v4  ;;  %v2840_v4 = vld [vmem:[%s5708_s2 + $0x320] sm:$0xff]  ;;  %v2859_v55 = vld [vmem:[%s5708_s2 + $0x3b8] sm:$0xff] }
 0x17e   : > { %3878 = vmatmul.mubr.f32.gmra.mrb[68].mxu0 %v2146_v59  ;;  %v2841_v59 = vld [vmem:[%s5708_s2 + $0x328] sm:$0xff] }
 0x17f   : > { %3880 = vmatprep.mubr.f32.mxu0 %v2147_v7  ;;  %v4181_v7 = vpack.c.bf16 %v2841_v59, %v2840_v4  ;;  %v2867_v4 = vld [vmem:[%s5708_s2 + $0x3f8] sm:$0xff] }
 0x180   : > { %3636 = vmatmul.mubr.f32.vlgmr.msra.gmra.mrb[0].mxu1 %v1310_v9  ;;  %v5375_v9 = vld [vmem:[#allocation2 + $0x2c] sm:$0xff] }
 0x181   : > { %4144 = vmatpush3.bf16.msra.mxu1 %v4141_v58  ;;  %3638 = vmatprep.mubr.f32.mxu1 %v1311_v19  ;;  %v1325_v58 = vld [vmem:[#allocation2 + $0x93] sm:$0xff] }
 0x182   : > { %4146 = vmatprep.subr.bf16.mxu1 %v4145_v5  ;;  %3881 = vmatmul.mubr.f32.gmra.mrb[70].mxu0 %v2148_v13  ;;  %v5384_v19 = vld [vmem:[#allocation2 + $0x34] sm:$0xff]  ;;  %v4185_v13 = vpack.c.bf16 %v2843_v11, %v2842_v10  ;;  %v1742_v11 = vld [vmem:[#allocation2 + $0xac] sm:$0xff] }
 0x183   : > { %3883 = vmatprep.mubr.f32.mxu0 %v2149_v15  ;;  %v2844_v15 = vld [vmem:[%s5708_s2 + $0x340] sm:$0xff]  ;;  %v2369_v10 = vld [vmem:[%s5709_s3 + $0x10] sm:$0xff] }
 0x184   : > { %3639 = vmatmul.mubr.f32.gmra.mrb[2].mxu1 %v1312_v17  ;;  %v2845_v17 = vld [vmem:[%s5708_s2 + $0x348] sm:$0xff] }
 0x185   : > { %3641 = vmatprep.mubr.f32.mxu1 %v1313_v20  ;;  %4148 = vmatpush3.bf16.msra.mxu1 %v4145_v5  ;;  %v5372_v5 = vld [vmem:[#allocation2 + $0x24] sm:$0xff]  ;;  %v4189_v18 = vpack.c.bf16 %v2845_v17, %v2844_v15  ;;  %v5396_v20 = vld [vmem:[#allocation2 + $0x4c] sm:$0xff] }
 0x186   : > { %4150 = vmatprep.subr.bf16.mxu1 %v4149_v14  ;;  %3884 = vmatmul.mubr.f32.gmra.mrb[72].mxu0 %v2150_v22  ;;  %v2846_v22 = vld [vmem:[%s5708_s2 + $0x350] sm:$0xff]  ;;  %v2371_v17 = vld [vmem:[%s5709_s3 + $0x20] sm:$0xff] }
 0x187   : > { %3886 = vmatprep.mubr.f32.mxu0 %v2151_v38  ;;  %v1525_v38 = vld [vmem:[#allocation2 + $0x54] sm:$0xff] }
 0x188   : > { %3642 = vmatmul.mubr.f32.gmra.mrb[4].mxu1 %v1314_v24 }
 0x189   : > { %3644 = vmatprep.mubr.f32.mxu1 %v1315_v6  ;;  %4152 = vmatpush3.bf16.msra.mxu1 %v4149_v14  ;;  %v5387_v14 = vld [vmem:[#allocation2 + $0x3c] sm:$0xff]  ;;  %v2849_v6 = vld [vmem:[%s5708_s2 + $0x368] sm:$0xff] }
 0x18a   : > { %4154 = vmatprep.subr.bf16.mxu1 %v4153_v23  ;;  %3887 = vmatmul.mubr.f32.gmra.mrb[74].mxu0 %v2152_v46  ;;  %v1527_v46 = vld [vmem:[#allocation2 + $0x64] sm:$0xff] }
 0x18b   : > { %3889 = vmatprep.mubr.f32.mxu0 %v2153_v30  ;;  %v1528_v30 = vld [vmem:[#allocation2 + $0x6c] sm:$0xff] }
 0x18c   : > { %3645 = vmatmul.mubr.f32.gmra.mrb[6].mxu1 %v1316_v31  ;;  %v2850_v31 = vld [vmem:[%s5708_s2 + $0x370] sm:$0xff] }
 0x18d   : > { %3647 = vmatprep.mubr.f32.mxu1 %v1317_v60  ;;  %4156 = vmatpush3.bf16.msra.mxu1 %v4153_v23  ;;  %v2847_v23 = vld [vmem:[%s5708_s2 + $0x358] sm:$0xff]  ;;  %v4201_v60 = vpack.c.bf16 %v2851_v33, %v2850_v31  ;;  %v2377_v31 = vld [vmem:[%s5709_s3 + $0x50] sm:$0xff] }
 0x18e   : > { %4158 = vmatprep.subr.bf16.mxu1 %v4157_v53  ;;  %3890 = vmatmul.mubr.f32.gmra.mrb[76].mxu0 %v2154_v3  ;;  %v4193_v24 = vpack.c.bf16 %v2847_v23, %v2846_v22  ;;  %v1530_v3 = vld [vmem:[#allocation2 + $0x7c] sm:$0xff]  ;;  %v2373_v23 = vld [vmem:[%s5709_s3 + $0x30] sm:$0xff] }
 0x18f   : > { %3892 = vmatprep.mubr.f32.mxu0 %v2155_v35  ;;  %v2852_v35 = vld [vmem:[%s5708_s2 + $0x380] sm:$0xff]  ;;  %v1935_v22 = vld [vmem:[#allocation2 + $0x35] sm:$0xff] }
 0x190   : > { %3648 = vmatmul.mubr.f32.gmra.mrb[8].mxu1 %v1318_v40  ;;  %v1531_v40 = vld [vmem:[#allocation2 + $0x84] sm:$0xff]  ;;  %v2378_v33 = vld [vmem:[%s5709_s3 + $0x58] sm:$0xff] }
 0x191   : > { %3650 = vmatprep.mubr.f32.mxu1 %v1319_v8  ;;  %4160 = vmatpush3.bf16.msra.mxu1 %v4157_v53  ;;  %v4197_v53 = vpack.c.bf16 %v2849_v6, %v2848_v27  ;;  %v1533_v8 = vld [vmem:[#allocation2 + $0x94] sm:$0xff]  ;;  %v1937_v27 = vld [vmem:[#allocation2 + $0x45] sm:$0xff] }
 0x192   : > { %4162 = vmatprep.subr.bf16.mxu1 %v4161_v37  ;;  %3893 = vmatmul.mubr.f32.gmra.mrb[78].mxu0 %v2156_v12  ;;  %v1534_v12 = vld [vmem:[#allocation2 + $0x9c] sm:$0xff] }
 0x193   : > { %v2375_v6 = vld [vmem:[%s5709_s3 + $0x40] sm:$0xff] }
 0x194   : > { %3651 = vmatmul.mubr.f32.gmra.mrb[10].mxu1 %v1320_v48  ;;  %v2855_v48 = vld [vmem:[%s5708_s2 + $0x398] sm:$0xff] }
 0x195   : > { %3653 = vmatprep.mubr.f32.mxu1 %v1321_v54  ;;  %4164 = vmatpush3.bf16.msra.mxu1 %v4161_v37  ;;  %v2853_v37 = vld [vmem:[%s5708_s2 + $0x388] sm:$0xff] }
 0x196   : > { %4166 = vmatprep.subr.bf16.mxu1 %v4165_v44  ;;  %v4205_v42 = vpack.c.bf16 %v2853_v37, %v2852_v35  ;;  %v2857_v54 = vld [vmem:[%s5708_s2 + $0x3a8] sm:$0xff]  ;;  %v1943_v35 = vld [vmem:[#allocation2 + $0x75] sm:$0xff] }
 0x197   : > { %v1945_v37 = vld [vmem:[#allocation2 + $0x85] sm:$0xff] }
 0x198   : > { %3654 = vmatmul.mubr.f32.gmra.mrb[12].mxu1 %v1322_v21  ;;  %v2858_v21 = vld [vmem:[%s5708_s2 + $0x3b0] sm:$0xff] }
 0x199   : > { %3656 = vmatprep.mubr.f32.mxu1 %v1323_v25  ;;  %4168 = vmatpush3.bf16.msra.mxu1 %v4165_v44  ;;  %v2854_v44 = vld [vmem:[%s5708_s2 + $0x390] sm:$0xff]  ;;  %v4217_v56 = vpack.c.bf16 %v2859_v55, %v2858_v21  ;;  %v2860_v25 = vld [vmem:[%s5708_s2 + $0x3c0] sm:$0xff] }
 0x19a   : > { %4170 = vmatprep.subr.bf16.mxu1 %v4169_v16  ;;  %v4209_v50 = vpack.c.bf16 %v2855_v48, %v2854_v44 }
 0x19c   : > { %3657 = vmatmul.mubr.f32.gmra.mrb[14].mxu1 %v1324_v57 }
 0x19d   : > { %3659 = vmatprep.mubr.f32.mxu1 %v1325_v58  ;;  %4172 = vmatpush3.bf16.msra.mxu1 %v4169_v16  ;;  %v4213_v16 = vpack.c.bf16 %v2857_v54, %v2856_v52  ;;  %v2862_v58 = vld [vmem:[%s5708_s2 + $0x3d0] sm:$0xff] }
 0x19e   : > { %4174 = vmatprep.subr.bf16.mxu1 %v4173_v29 }
 0x1a0   : > { %3660 = vmatmul.mubr.f32.gmra.mrb[16].mxu1 %v1326_v61  ;;  %v2863_v61 = vld [vmem:[%s5708_s2 + $0x3d8] sm:$0xff] }
 0x1a1   : > { %3694 = vmatprep.mubr.f32.mxu1 %v1517_v1  ;;  %v4225_v62 = vpack.c.bf16 %v2863_v61, %v2862_v58  ;;  %v2865_v1 = vld [vmem:[%s5708_s2 + $0x3e8] sm:$0xff]  ;;  %v2379_v58 = vld [vmem:[%s5709_s3 + $0x60] sm:$0xff] }
 0x1a2   : > { %v2380_v61 = vld [vmem:[%s5709_s3 + $0x68] sm:$0xff] }
 0x1a4   : > { %3695 = vmatmul.mubr.f32.vlgmr.msra.gmra.mrb[0].mxu1 %v1518_v49  ;;  %v2866_v49 = vld [vmem:[%s5708_s2 + $0x3f0] sm:$0xff] }
 0x1a5   : > { %4176 = vmatpush3.bf16.msra.mxu1 %v4173_v29  ;;  %3697 = vmatprep.mubr.f32.mxu1 %v5372_v5  ;;  %v2861_v29 = vld [vmem:[%s5708_s2 + $0x3c8] sm:$0xff]  ;;  %v4233_v59 = vpack.c.bf16 %v2867_v4, %v2866_v49  ;;  %v2382_v49 = vld [vmem:[%s5709_s3 + $0x78] sm:$0xff] }
 0x1a6   : > { %4178 = vmatprep.subr.bf16.mxu1 %v4177_v39  ;;  %v4221_v57 = vpack.c.bf16 %v2861_v29, %v2860_v25 }
 0x1a8   : > { %3698 = vmatmul.mubr.f32.gmra.mrb[2].mxu1 %v5375_v9 }
 0x1a9   : > { %3700 = vmatprep.mubr.f32.mxu1 %v5384_v19  ;;  %4180 = vmatpush3.bf16.msra.mxu1 %v4177_v39  ;;  %v4229_v39 = vpack.c.bf16 %v2865_v1, %v2864_v0  ;;  %v4293_v0 = vpack.c.bf16 %v2380_v61, %v2379_v58 }
 0x1aa   : > { %4182 = vmatprep.subr.bf16.mxu1 %v4181_v7 }
 0x1ac   : > { %3701 = vmatmul.mubr.f32.gmra.mrb[4].mxu1 %v5387_v14 }
 0x1ad   : > { %3703 = vmatprep.mubr.f32.mxu1 %v1523_v28  ;;  %4184 = vmatpush3.bf16.msra.mxu1 %v4181_v7  ;;  %v2367_v7 = vld [vmem:[%s5709_s3] sm:$0xff] }
 0x1ae   : > { %4186 = vmatprep.subr.bf16.mxu1 %v4185_v13 }
 0x1b0   : > { %3704 = vmatmul.mubr.f32.gmra.mrb[6].mxu1 %v5396_v20 }
 0x1b1   : > { %3706 = vmatprep.mubr.f32.mxu1 %v1525_v38  ;;  %4188 = vmatpush3.bf16.msra.mxu1 %v4185_v13  ;;  %v2370_v13 = vld [vmem:[%s5709_s3 + $0x18] sm:$0xff] }
 0x1b2   : > { %4190 = vmatprep.subr.bf16.mxu1 %v4189_v18  ;;  %v4273_v15 = vpack.c.bf16 %v2370_v13, %v2369_v10 }
 0x1b4   : > { %3707 = vmatmul.mubr.f32.gmra.mrb[8].mxu1 %v1526_v26 }
 0x1b5   : > { %3709 = vmatprep.mubr.f32.mxu1 %v1527_v46  ;;  %4192 = vmatpush3.bf16.msra.mxu1 %v4189_v18  ;;  %v1934_v18 = vld [vmem:[#allocation2 + $0x2d] sm:$0xff] }
 0x1b6   : > { %4194 = vmatprep.subr.bf16.mxu1 %v4193_v24 }
 0x1b8   : > { %3710 = vmatmul.mubr.f32.gmra.mrb[10].mxu1 %v1528_v30 }
 0x1b9   : > { %3712 = vmatprep.mubr.f32.mxu1 %v1529_v34  ;;  %4196 = vmatpush3.bf16.msra.mxu1 %v4193_v24  ;;  %v1936_v24 = vld [vmem:[#allocation2 + $0x3d] sm:$0xff] }
 0x1ba   : > { %4198 = vmatprep.subr.bf16.mxu1 %v4197_v53 }
 0x1bc   : > { %3713 = vmatmul.mubr.f32.gmra.mrb[12].mxu1 %v1530_v3 }
 0x1bd   : > { %3715 = vmatprep.mubr.f32.mxu1 %v1531_v40  ;;  %4200 = vmatpush3.bf16.msra.mxu1 %v4197_v53 }
 0x1be   : > { %4202 = vmatprep.subr.bf16.mxu1 %v4201_v60 }
 0x1c0   : > { %3716 = vmatmul.mubr.f32.gmra.mrb[14].mxu1 %v1532_v43 }
 0x1c1   : > { %3718 = vmatprep.mubr.f32.mxu1 %v1533_v8  ;;  %4204 = vmatpush3.bf16.msra.mxu1 %v4201_v60  ;;  %v1941_v60 = vld [vmem:[#allocation2 + $0x65] sm:$0xff] }
 0x1c2   : > { %4206 = vmatprep.subr.bf16.mxu1 %v4205_v42 }
 0x1c4   : > { %3719 = vmatmul.mubr.f32.gmra.mrb[16].mxu1 %v1534_v12 }
 0x1c5   : > { %3753 = vmatprep.mubr.f32.mxu1 %v5372_v5  ;;  %v1741_v5 = vld [vmem:[#allocation2 + $0xa4] sm:$0xff] }
 0x1c8   : > { %3754 = vmatmul.mubr.f32.vlgmr.msra.gmra.mrb[0].mxu1 %v5375_v9  ;;  %v2368_v9 = vld [vmem:[%s5709_s3 + $0x8] sm:$0xff] }
 0x1c9   : > { %4208 = vmatpush3.bf16.msra.mxu1 %v4205_v42  ;;  %3756 = vmatprep.mubr.f32.mxu1 %v5384_v19  ;;  %v4269_v19 = vpack.c.bf16 %v2368_v9, %v2367_v7  ;;  %v1949_v42 = vld [vmem:[#allocation2 + $0xa5] sm:$0xff] }
 0x1ca   : > { %4210 = vmatprep.subr.bf16.mxu1 %v4209_v50 }
 0x1cb   : > { %4270 = vmatprep.subr.bf16.mxu0 %v4269_v19 }
 0x1cc   : > { %3757 = vmatmul.mubr.f32.gmra.mrb[2].mxu1 %v5387_v14  ;;  %v1933_v14 = vld [vmem:[#allocation2 + $0x25] sm:$0xff]  ;;  %4272 = vmatpush3.bf16.msra.mxu0 %v4269_v19 }
 0x1cd   : > { %3759 = vmatprep.mubr.f32.mxu1 %v1523_v28  ;;  %4212 = vmatpush3.bf16.msra.mxu1 %v4209_v50  ;;  %v2372_v28 = vld [vmem:[%s5709_s3 + $0x28] sm:$0xff] }
 0x1ce   : > { %4214 = vmatprep.subr.bf16.mxu1 %v4213_v16  ;;  %4274 = vmatprep.subr.bf16.mxu0 %v4273_v15 }
 0x1d0   : > { %3760 = vmatmul.mubr.f32.gmra.mrb[4].mxu1 %v5396_v20  ;;  %v4277_v20 = vpack.c.bf16 %v2372_v28, %v2371_v17  ;;  %4276 = vmatpush3.bf16.msra.mxu0 %v4273_v15 }
 0x1d1   : > { %3762 = vmatprep.mubr.f32.mxu1 %v1525_v38  ;;  %4216 = vmatpush3.bf16.msra.mxu1 %v4213_v16  ;;  %v2374_v38 = vld [vmem:[%s5709_s3 + $0x38] sm:$0xff] }
 0x1d2   : > { %4218 = vmatprep.subr.bf16.mxu1 %v4217_v56  ;;  %4278 = vmatprep.subr.bf16.mxu0 %v4277_v20 }
 0x1d4   : > { %3763 = vmatmul.mubr.f32.gmra.mrb[6].mxu1 %v1526_v26  ;;  %v4281_v26 = vpack.c.bf16 %v2374_v38, %v2373_v23  ;;  %4280 = vmatpush3.bf16.msra.mxu0 %v4277_v20 }
 0x1d5   : > { %3765 = vmatprep.mubr.f32.mxu1 %v1527_v46  ;;  %4220 = vmatpush3.bf16.msra.mxu1 %v4217_v56  ;;  %v2376_v46 = vld [vmem:[%s5709_s3 + $0x48] sm:$0xff] }
 0x1d6   : > { %4222 = vmatprep.subr.bf16.mxu1 %v4221_v57  ;;  %4282 = vmatprep.subr.bf16.mxu0 %v4281_v26  ;;  %v4285_v53 = vpack.c.bf16 %v2376_v46, %v2375_v6 }
 0x1d8   : > { %3766 = vmatmul.mubr.f32.gmra.mrb[8].mxu1 %v1528_v30  ;;  %v1939_v30 = vld [vmem:[#allocation2 + $0x55] sm:$0xff]  ;;  %4284 = vmatpush3.bf16.msra.mxu0 %v4281_v26 }
 0x1d9   : > { %3768 = vmatprep.mubr.f32.mxu1 %v1529_v34  ;;  %4224 = vmatpush3.bf16.msra.mxu1 %v4221_v57  ;;  %v4289_v34 = vpack.c.bf16 %v2378_v33, %v2377_v31 }
 0x1da   : > { %4226 = vmatprep.subr.bf16.mxu1 %v4225_v62  ;;  %4286 = vmatprep.subr.bf16.mxu0 %v4285_v53 }
 0x1dc   : > { %3769 = vmatmul.mubr.f32.gmra.mrb[10].mxu1 %v1530_v3  ;;  %4288 = vmatpush3.bf16.msra.mxu0 %v4285_v53  ;;  %v1942_v3 = vld [vmem:[#allocation2 + $0x6d] sm:$0xff] }
 0x1dd   : > { %3771 = vmatprep.mubr.f32.mxu1 %v1531_v40  ;;  %4228 = vmatpush3.bf16.msra.mxu1 %v4225_v62  ;;  %v1947_v40 = vld [vmem:[#allocation2 + $0x95] sm:$0xff] }
 0x1de   : > { %4230 = vmatprep.subr.bf16.mxu1 %v4229_v39  ;;  %4290 = vmatprep.subr.bf16.mxu0 %v4289_v34 }
 0x1e0   : > { %3772 = vmatmul.mubr.f32.gmra.mrb[12].mxu1 %v1532_v43  ;;  %4292 = vmatpush3.bf16.msra.mxu0 %v4289_v34  ;;  %v1950_v43 = vld [vmem:[#allocation2 + $0xad] sm:$0xff] }
 0x1e1   : > { %3774 = vmatprep.mubr.f32.mxu1 %v1533_v8  ;;  %4232 = vmatpush3.bf16.msra.mxu1 %v4229_v39  ;;  %v2157_v8 = vld [vmem:[#allocation2 + $0xa6] sm:$0xff]  ;;  %v2381_v39 = vld [vmem:[%s5709_s3 + $0x70] sm:$0xff] }
 0x1e2   : > { %4234 = vmatprep.subr.bf16.mxu1 %v4233_v59  ;;  %4294 = vmatprep.subr.bf16.mxu0 %v4293_v0 }
 0x1e4   : > { %3775 = vmatmul.mubr.f32.gmra.mrb[14].mxu1 %v1534_v12  ;;  %4296 = vmatpush3.bf16.msra.mxu0 %v4293_v0 }
 0x1e5   : > { %3777 = vmatprep.mubr.f32.mxu1 %v1741_v5  ;;  %4236 = vmatpush3.bf16.msra.mxu1 %v4233_v59  ;;  %v4297_v59 = vpack.c.bf16 %v2382_v49, %v2381_v39 }
 0x1e6   : > { %4301 = vmatprep.subr.bf16.mxu1 %v5113_v45 }
 0x1e7   : > { %4298 = vmatprep.subr.bf16.mxu0 %v4297_v59 }
 0x1e8   : > { %3778 = vmatmul.mubr.f32.gmra.mrb[16].mxu1 %v1742_v11  ;;  %4300 = vmatpush3.bf16.msra.mxu0 %v4297_v59 }
 0x1e9   : > { %3812 = vmatprep.mubr.f32.mxu1 %v1933_v14 }
 0x1ec   : > { %3813 = vmatmul.mubr.f32.vlgmr.msra.gmra.mrb[0].mxu1 %v1934_v18 }
 0x1ed   : > { %4309 = vmatpush3.bf16.msra.mxu1 %v5113_v45  ;;  %3815 = vmatprep.mubr.f32.mxu1 %v1935_v22  ;;  %v1938_v45 = vld [vmem:[#allocation2 + $0x4d] sm:$0xff] }
 0x1ee   : > { %4302 = vmatprep.subr.bf16.mxu1 %v5173_v36 }
 0x1f0   : > { %3816 = vmatmul.mubr.f32.gmra.mrb[2].mxu1 %v1936_v24 }
 0x1f1   : > { %3818 = vmatprep.mubr.f32.mxu1 %v1937_v27  ;;  %4310 = vmatpush3.bf16.msra.mxu1 %v5173_v36  ;;  %v1940_v36 = vld [vmem:[#allocation2 + $0x5d] sm:$0xff] }
 0x1f2   : > { %4303 = vmatprep.subr.bf16.mxu1 %v5186_v47 }
 0x1f4   : > { %3819 = vmatmul.mubr.f32.gmra.mrb[4].mxu1 %v1938_v45 }
 0x1f5   : > { %3821 = vmatprep.mubr.f32.mxu1 %v1939_v30  ;;  %4311 = vmatpush3.bf16.msra.mxu1 %v5186_v47  ;;  %v1944_v47 = vld [vmem:[#allocation2 + $0x7d] sm:$0xff] }
 0x1f6   : > { %4304 = vmatprep.subr.bf16.mxu1 %v5207_v63 }
 0x1f8   : > { %3822 = vmatmul.mubr.f32.gmra.mrb[6].mxu1 %v1940_v36 }
 0x1f9   : > { %3824 = vmatprep.mubr.f32.mxu1 %v1941_v60  ;;  %4312 = vmatpush3.bf16.msra.mxu1 %v5207_v63  ;;  %v1946_v63 = vld [vmem:[#allocation2 + $0x8d] sm:$0xff] }
 0x1fa   : > { %4305 = vmatprep.subr.bf16.mxu1 %v5235_v2 }
 0x1fc   : > { %3825 = vmatmul.mubr.f32.gmra.mrb[8].mxu1 %v1942_v3 }
 0x1fd   : > { %3827 = vmatprep.mubr.f32.mxu1 %v1943_v35  ;;  %4313 = vmatpush3.bf16.msra.mxu1 %v5235_v2  ;;  %v1948_v2 = vld [vmem:[#allocation2 + $0x9d] sm:$0xff] }
 0x1fe   : > { %4306 = vmatprep.subr.bf16.mxu1 %v5254_v32 }
 0x200   : > { %3828 = vmatmul.mubr.f32.gmra.mrb[10].mxu1 %v1944_v47 }
 0x201   : > { %3830 = vmatprep.mubr.f32.mxu1 %v1945_v37  ;;  %4314 = vmatpush3.bf16.msra.mxu1 %v5254_v32  ;;  %v2158_v32 = vld [vmem:[#allocation2 + $0xae] sm:$0xff] }
 0x202   : > { %4307 = vmatprep.subr.bf16.mxu1 %v5272_v41 }
 0x204   : > { %3831 = vmatmul.mubr.f32.gmra.mrb[12].mxu1 %v1946_v63 }
 0x205   : > { %3833 = vmatprep.mubr.f32.mxu1 %v1947_v40  ;;  %4315 = vmatpush3.bf16.msra.mxu1 %v5272_v41 }
 0x206   : > { %4308 = vmatprep.subr.bf16.mxu1 %v5290_v51 }
 0x208   : > { %3834 = vmatmul.mubr.f32.gmra.mrb[14].mxu1 %v1948_v2 }
 0x209   : > { %3836 = vmatprep.mubr.f32.mxu1 %v1949_v42  ;;  %4316 = vmatpush3.bf16.msra.mxu1 %v5290_v51 }
 0x20c   : > { %3837 = vmatmul.mubr.f32.gmra.mrb[16].mxu1 %v1950_v43 }
 0x20d   : > { %3895 = vmatprep.mubr.f32.mxu1 %v2157_v8 }
 0x214   : > { %3896 = vmatmul.mubr.f32.vlgmr.msra.gmra.mrb[16].mxu1 %v2158_v32 }
 0x223   : > { %v3460_v12 = vpop.f32.mrb[46].mxu0 }
 0x224   : > { %v804_v44 = vpop.f32.mrb[47].mxu0 }
 0x227   : > { %v3463_v48 = vpop.f32.mrb[48].mxu0 }
 0x228   : > { %v814_v50 = vpop.f32.mrb[49].mxu0 }
 0x22b   : > { %v3466_v52 = vpop.f32.mrb[50].mxu0 }
 0x22c   : > { %v824_v41 = vpop.f32.mrb[51].mxu0 }
 0x22f   : > { %v5522_v54 = vpop.f32.mrb[52].mxu0 }
 0x230   : > { %v5524_v16 = vpop.f32.mrb[53].mxu0 }
 0x233   : > { %v5526_v21 = vpop.f32.mrb[54].mxu0 }
 0x234   : > { %v5528_v55 = vpop.f32.mrb[55].mxu0 }
 0x237   : > { %v5530_v51 = vpop.f32.mrb[56].mxu0 }
 0x238   : > { %v5532_v56 = vpop.f32.mrb[57].mxu0 }
 0x23b   : > { %v5534_v25 = vpop.f32.mrb[58].mxu0 }
 0x23c   : > { %v5536_v29 = vpop.f32.mrb[59].mxu0 }
 0x23f   : > { %v5538_v57 = vpop.f32.mrb[60].mxu0 }
 0x240   : > { %v5546_v62 = vpop.f32.mrb[61].mxu0 }
 0x243   : > { %v5548_v1 = vpop.f32.mrb[62].mxu0 }
 0x244   : > { %v5556_v4 = vpop.f32.mrb[63].mxu0 }
 0x249   : > { %v3873_v5 = vpop.f32.mrb[64].mxu0 }
 0x24a   : > { %v2242_v7 = vpop.f32.mrb[65].mxu0 }
 0x24d   : > { %v3876_v9 = vpop.f32.mrb[66].mxu0 }
 0x24e   : > { %v2252_v10 = vpop.f32.mrb[67].mxu0 }
 0x251   : > { %v3879_v11 = vpop.f32.mrb[68].mxu0 }
 0x252   : > { %v2262_v19 = vpop.f32.mrb[69].mxu0 }
 0x255   : > { %v3882_v13 = vpop.f32.mrb[70].mxu0 }
 0x256   : > { %v2272_v14 = vpop.f32.mrb[71].mxu0 }
 0x259   : > { %v3885_v15 = vpop.f32.mrb[72].mxu0 }
 0x25a   : > { %v2282_v17 = vpop.f32.mrb[73].mxu0 }
 0x25d   : > { %v3888_v28 = vpop.f32.mrb[74].mxu0 }
 0x25e   : > { %v2292_v18 = vpop.f32.mrb[75].mxu0 }
 0x261   : > { %v5558_v20 = vpop.f32.mrb[76].mxu0 }
 0x262   : > { %v5560_v22 = vpop.f32.mrb[77].mxu0 }
 0x265   : > { %v5562_v23 = vpop.f32.mrb[78].mxu0 }
 0x266   : > { %v5564_v38 = vpop.f32.mrb[79].mxu0 }
 0x2bf   : > { %v3814_v24 = vpop.f32.mrb[0].mxu1 }
 0x2c0   : > { %v4317_v26 = vadd.f32 %v3814_v24, %v3460_v12  ;;  %v2034_v27 = vpop.f32.mrb[1].mxu1 }
 0x2c1   : > { %v4319_v6 = vadd.f32 %v2034_v27, %v804_v44 }
 0x2c2   : > { %v4318_v46 = vadd.f32 %v4317_v26, %v3873_v5 }
 0x2c3   : > { %v4320_v45 = vadd.f32 %v4319_v6, %v2242_v7  ;;  %v3817_v53 = vpop.f32.mrb[2].mxu1 }
 0x2c4   : > { %v4321_v30 = vadd.f32 %v3817_v53, %v3463_v48  ;;  %v2044_v31 = vpop.f32.mrb[3].mxu1  ;;  %v2350_v34 = vmax.f32 %v4318_v46, 0.0 }
 0x2c5   : > { %v2349_v33 = vmax.f32 %v4320_v45, 0.0  ;;  %v4323_v36 = vadd.f32 %v2044_v31, %v814_v50 }
 0x2c6   : > { %v4322_v60 = vadd.f32 %v4321_v30, %v3876_v9 }
 0x2c7   : > { %v4324_v3 = vadd.f32 %v4323_v36, %v2252_v10  ;;  %v3820_v35 = vpop.f32.mrb[4].mxu1  ;;  %3930 = vmatprep.mubr.f32.mxu0 %v2349_v33 }
 0x2c8   : > { %v4325_v47 = vadd.f32 %v3820_v35, %v3466_v52  ;;  %v2054_v37 = vpop.f32.mrb[5].mxu1  ;;  %3931 = vmatmul.mubr.f32.vlgmr.msra.gmra.mrb[80].mxu0 %v2350_v34  ;;  %v2352_v2 = vmax.f32 %v4322_v60, 0.0  ;;  %v4543_v35 = vld [vmem:[%s4879_s30 + $0x18] sm:$0xff] }
 0x2c9   : > { %v2351_v63 = vmax.f32 %v4324_v3, 0.0  ;;  %v4327_v40 = vadd.f32 %v2054_v37, %v824_v41 }
 0x2ca   : > { %v4326_v42 = vadd.f32 %v4325_v47, %v3879_v11 }
 0x2cb   : > { %v4328_v43 = vadd.f32 %v4327_v40, %v2262_v19  ;;  %v3823_v8 = vpop.f32.mrb[6].mxu1  ;;  %3933 = vmatprep.mubr.f32.mxu0 %v2351_v63 }
 0x2cc   : > { %v4329_v32 = vadd.f32 %v3823_v8, %v5522_v54  ;;  %v2064_v12 = vpop.f32.mrb[7].mxu1  ;;  %3934 = vmatmul.mubr.f32.gmra.mrb[82].mxu0 %v2352_v2  ;;  %v2354_v50 = vmax.f32 %v4326_v42, 0.0  ;;  %v4544_v8 = vld [vmem:[%s4879_s30 + $0x20] sm:$0xff] }
 0x2cd   : > { %v2353_v44 = vmax.f32 %v4328_v43, 0.0  ;;  %v4331_v48 = vadd.f32 %v2064_v12, %v5524_v16  ;;  %v4545_v12 = vld [vmem:[%s4879_s30 + $0x28] sm:$0xff] }
 0x2ce   : > { %v4330_v58 = vadd.f32 %v4329_v32, %v3882_v13 }
 0x2cf   : > { %v4332_v61 = vadd.f32 %v4331_v48, %v2272_v14  ;;  %v3826_v52 = vpop.f32.mrb[8].mxu1  ;;  %3936 = vmatprep.mubr.f32.mxu0 %v2353_v44 }
 0x2d0   : > { %v4333_v0 = vadd.f32 %v3826_v52, %v5526_v21  ;;  %v2074_v41 = vpop.f32.mrb[9].mxu1  ;;  %3937 = vmatmul.mubr.f32.gmra.mrb[84].mxu0 %v2354_v50  ;;  %v2356_v59 = vmax.f32 %v4330_v58, 0.0 }
 0x2d1   : > { %v2355_v39 = vmax.f32 %v4332_v61, 0.0  ;;  %v4335_v49 = vadd.f32 %v2074_v41, %v5528_v55  ;;  %v4546_v41 = vld [vmem:[%s4879_s30 + $0x30] sm:$0xff] }
 0x2d2   : > { %v4334_v5 = vadd.f32 %v4333_v0, %v3885_v15 }
 0x2d3   : > { %v4336_v54 = vadd.f32 %v4335_v49, %v2282_v17  ;;  %v3829_v7 = vpop.f32.mrb[10].mxu1  ;;  %3939 = vmatprep.mubr.f32.mxu0 %v2355_v39  ;;  %v4547_v49 = vld [vmem:[%s4879_s30 + $0x38] sm:$0xff] }
 0x2d4   : > { %v4337_v9 = vadd.f32 %v3829_v7, %v5530_v51  ;;  %v2084_v16 = vpop.f32.mrb[11].mxu1  ;;  %3940 = vmatmul.mubr.f32.gmra.mrb[86].mxu0 %v2356_v59  ;;  %v2358_v19 = vmax.f32 %v4334_v5, 0.0 }
 0x2d5   : > { %v2357_v10 = vmax.f32 %v4336_v54, 0.0  ;;  %v4339_v11 = vadd.f32 %v2084_v16, %v5532_v56 }
 0x2d6   : > { %v4338_v13 = vadd.f32 %v4337_v9, %v3888_v28 }
 0x2d7   : > { %v4340_v21 = vadd.f32 %v4339_v11, %v2292_v18  ;;  %v3832_v14 = vpop.f32.mrb[12].mxu1  ;;  %3942 = vmatprep.mubr.f32.mxu0 %v2357_v10  ;;  %v4548_v11 = vld [vmem:[%s4879_s30 + $0x40] sm:$0xff] }
 0x2d8   : > { %v4341_v24 = vadd.f32 %v3832_v14, %v5534_v25  ;;  %v2094_v55 = vpop.f32.mrb[13].mxu1  ;;  %3943 = vmatmul.mubr.f32.gmra.mrb[88].mxu0 %v2358_v19  ;;  %v2360_v26 = vmax.f32 %v4338_v13, 0.0  ;;  %v4549_v13 = vld [vmem:[%s4879_s30 + $0x48] sm:$0xff] }
 0x2d9   : > { %v2359_v15 = vmax.f32 %v4340_v21, 0.0  ;;  %v4343_v17 = vadd.f32 %v2094_v55, %v5536_v29 }
 0x2da   : > { %v4342_v51 = vadd.f32 %v4341_v24, %v5558_v20 }
 0x2db   : > { %v4344_v27 = vadd.f32 %v4343_v17, %v5560_v22  ;;  %v3835_v6 = vpop.f32.mrb[14].mxu1  ;;  %3945 = vmatprep.mubr.f32.mxu0 %v2359_v15 }
 0x2dc   : > { %v4345_v56 = vadd.f32 %v3835_v6, %v5538_v57  ;;  %v2104_v28 = vpop.f32.mrb[15].mxu1  ;;  %3946 = vmatmul.mubr.f32.gmra.mrb[90].mxu0 %v2360_v26  ;;  %v2362_v25 = vmax.f32 %v4342_v51, 0.0  ;;  %v4550_v51 = vld [vmem:[%s4879_s30 + $0x50] sm:$0xff]  ;;  %v4551_v6 = vld [vmem:[%s4879_s30 + $0x58] sm:$0xff] }
 0x2dd   : > { %v2361_v18 = vmax.f32 %v4344_v27, 0.0  ;;  %v4347_v46 = vadd.f32 %v2104_v28, %v5546_v62 }
 0x2de   : > { %v4346_v45 = vadd.f32 %v4345_v56, %v5562_v23 }
 0x2df   : > { %v4348_v29 = vadd.f32 %v4347_v46, %v5564_v38  ;;  %3948 = vmatprep.mubr.f32.mxu0 %v2361_v18 }
 0x2e0   : > { %3949 = vmatmul.mubr.f32.gmra.mrb[92].mxu0 %v2362_v25  ;;  %v2364_v22 = vmax.f32 %v4346_v45, 0.0 }
 0x2e1   : > { %v2363_v20 = vmax.f32 %v4348_v29, 0.0 }
 0x2e3   : > { %3951 = vmatprep.mubr.f32.mxu0 %v2363_v20  ;;  %v4552_v20 = vld [vmem:[%s4879_s30 + $0x60] sm:$0xff] }
 0x2e4   : > { %3952 = vmatmul.mubr.f32.gmra.mrb[94].mxu0 %v2364_v22 }
 0x2e7   : > { %v3897_v53 = vpop.f32.mrb[16].mxu1 }
 0x2e8   : > { %v4349_v57 = vadd.f32 %v3897_v53, %v5548_v1  ;;  %v2322_v30 = vpop.f32.mrb[17].mxu1  ;;  %v4542_v1 = vld [vmem:[%s4879_s30 + $0x10] sm:$0xff]  ;;  %v4553_v53 = vld [vmem:[%s4879_s30 + $0x68] sm:$0xff] }
 0x2e9   : > { %v4350_v62 = vadd.f32 %v2322_v30, %v5556_v4 }
 0x2ea   : > { %v2366_v23 = vmax.f32 %v4349_v57, 0.0 }
 0x2eb   : > { %v2365_v31 = vmax.f32 %v4350_v62, 0.0 }
 0x2ed   : > { %3954 = vmatprep.mubr.f32.mxu0 %v2365_v31 }
 0x2ee   : > { %3955 = vmatmul.mubr.f32.gmra.mrb[96].mxu0 %v2366_v23 }
 0x39b   : > { %v3932_v38 = vpop.f32.mrb[80].mxu0 }
 0x39c   : > { %v2558_v33 = vrot.slane %v3932_v38, 6  ;;  %v2449_v36 = vpop.f32.mrb[81].mxu0 }
 0x39d   : > { %v2557_v34 = vrot.slane %v2449_v36, 6  ;;  %v4554_v36 = vld [vmem:[%s4879_s30 + $0x70] sm:$0xff] }
 0x39f   : > { %v2559_v60 = vsel %vm2556_vm1, %v2557_v34, %v2558_v33  ;;  %v2611_v3 = vadd.f32 %v4542_v1, %v2557_v34  ;;  %v3935_v4 = vpop.f32.mrb[82].mxu0 }
 0x3a0   : > { %v2612_v47 = vadd.f32 %v4543_v35, %v2559_v60  ;;  %v2562_v37 = vrot.slane %v3935_v4, 6  ;;  %v2459_v63 = vpop.f32.mrb[83].mxu0  ;;  %v4555_v60 = vld [vmem:[%s4879_s30 + $0x78] sm:$0xff] }
 0x3a1   : > { %2630 = vst [vmem:[%s5588_s5 - $0x2] sm:$0xfc] %v2611_v3  ;;  %v2560_v40 = vrot.slane %v2459_v63, 6  ;;  %v4556_v63 = vld [vmem:[%s4879_s30 + $0x80] sm:$0xff] }
 0x3a2   : > { %2631 = vst [vmem:[%s5588_s5 + $0x6] sm:$0xff] %v2612_v47 }
 0x3a3   : > { %v2561_v2 = vsel %vm2556_vm1, %v2558_v33, %v2560_v40  ;;  %v2563_v42 = vsel %vm2556_vm1, %v2560_v40, %v2562_v37  ;;  %v3938_v43 = vpop.f32.mrb[84].mxu0 }
 0x3a4   : > { %v2613_v32 = vadd.f32 %v4544_v8, %v2561_v2  ;;  %v2614_v44 = vadd.f32 %v4545_v12, %v2563_v42  ;;  %v2566_v48 = vrot.slane %v3938_v43, 6  ;;  %v2469_v50 = vpop.f32.mrb[85].mxu0  ;;  %v4557_v2 = vld [vmem:[%s4879_s30 + $0x88] sm:$0xff] }
 0x3a5   : > { %v2564_v58 = vrot.slane %v2469_v50, 6 }
 0x3a6   : > { %2632 = vst [vmem:[%s5588_s5 + $0xe] sm:$0xff] %v2613_v32  ;;  %2633 = vst [vmem:[%s5588_s5 + $0x16] sm:$0xff] %v2614_v44  ;;  %v4558_v44 = vld [vmem:[%s4879_s30 + $0xa0] sm:$0xff] }
 0x3a7   : > { %v2565_v61 = vsel %vm2556_vm1, %v2562_v37, %v2564_v58  ;;  %v2567_v52 = vsel %vm2556_vm1, %v2564_v58, %v2566_v48  ;;  %v3941_v0 = vpop.f32.mrb[86].mxu0 }
 0x3a8   : > { %v2615_v39 = vadd.f32 %v4546_v41, %v2565_v61  ;;  %v2616_v59 = vadd.f32 %v4547_v49, %v2567_v52  ;;  %v2570_v5 = vrot.slane %v3941_v0, 6  ;;  %v2479_v54 = vpop.f32.mrb[87].mxu0  ;;  %v4559_v61 = vld [vmem:[%s4879_s30 + $0x90] sm:$0xff]  ;;  %v4560_v0 = vld [vmem:[%s4879_s30 + $0x98] sm:$0xff]  ;;  %s4567_s30 = scalar_lea.vmem %s4566_s23, 4608 }
 0x3a9   : > { %v2568_v7 = vrot.slane %v2479_v54, 6  ;;  %p4569_p5 = scmp.lt.s32.totalorder %s4567_s30, %s4561_s10 }
 0x3aa   : > { %2634 = vst [vmem:[%s5588_s5 + $0x1e] sm:$0xff] %v2615_v39  ;;  %2635 = vst [vmem:[%s5588_s5 + $0x26] sm:$0xff] %v2616_v59 }
 0x3ab   : > { %v2569_v9 = vsel %vm2556_vm1, %v2566_v48, %v2568_v7  ;;  %v2571_v16 = vsel %vm2556_vm1, %v2568_v7, %v2570_v5  ;;  %v3944_v10 = vpop.f32.mrb[88].mxu0  ;;  %p4570_p6 = por %p4569_p5, %p4568_p4 }
 0x3ac   : > { %v2617_v19 = vadd.f32 %v4548_v11, %v2569_v9  ;;  %v2618_v21 = vadd.f32 %v4549_v13, %v2571_v16  ;;  %v2574_v14 = vrot.slane %v3944_v10, 6  ;;  %v2489_v24 = vpop.f32.mrb[89].mxu0 }
 0x3ad   : > { %v2572_v55 = vrot.slane %v2489_v24, 6  ;;  %p4571_p7 = pnand %p4570_p6, %p4564_p2 }
 0x3ae   : > { %2636 = vst [vmem:[%s5588_s5 + $0x2e] sm:$0xff] %v2617_v19  ;;  %2637 = vst [vmem:[%s5588_s5 + $0x36] sm:$0xff] %v2618_v21 }
 0x3af   : > { %v2573_v15 = vsel %vm2556_vm1, %v2570_v5, %v2572_v55  ;;  %v2575_v17 = vsel %vm2556_vm1, %v2572_v55, %v2574_v14  ;;  %v3947_v26 = vpop.f32.mrb[90].mxu0 }
 0x3b0   : > { %v2619_v27 = vadd.f32 %v4550_v51, %v2573_v15  ;;  %v2620_v56 = vadd.f32 %v4551_v6, %v2575_v17  ;;  %v2578_v28 = vrot.slane %v3947_v26, 6  ;;  %v2499_v18 = vpop.f32.mrb[91].mxu0 }
 0x3b1   : > { %v2576_v46 = vrot.slane %v2499_v18, 6 }
 0x3b2   : > { %2638 = vst [vmem:[%s5588_s5 + $0x3e] sm:$0xff] %v2619_v27  ;;  %2639 = vst [vmem:[%s5588_s5 + $0x46] sm:$0xff] %v2620_v56 }
 0x3b3   : > { %v2577_v25 = vsel %vm2556_vm1, %v2574_v14, %v2576_v46  ;;  %v2579_v45 = vsel %vm2556_vm1, %v2576_v46, %v2578_v28  ;;  %v3950_v29 = vpop.f32.mrb[92].mxu0 }
 0x3b4   : > { %v2621_v22 = vadd.f32 %v4552_v20, %v2577_v25  ;;  %v2622_v57 = vadd.f32 %v4553_v53, %v2579_v45  ;;  %v2582_v30 = vrot.slane %v3950_v29, 6  ;;  %v2509_v62 = vpop.f32.mrb[93].mxu0 }
 0x3b5   : > { %v2580_v31 = vrot.slane %v2509_v62, 6 }
 0x3b6   : > { %2640 = vst [vmem:[%s5588_s5 + $0x4e] sm:$0xff] %v2621_v22  ;;  %2641 = vst [vmem:[%s5588_s5 + $0x56] sm:$0xff] %v2622_v57 }
 0x3b7   : > { %v2581_v23 = vsel %vm2556_vm1, %v2578_v28, %v2580_v31  ;;  %v2583_v38 = vsel %vm2556_vm1, %v2580_v31, %v2582_v30  ;;  %v3953_v33 = vpop.f32.mrb[94].mxu0 }
 0x3b8   : > { %v2623_v34 = vadd.f32 %v4554_v36, %v2581_v23  ;;  %v2624_v1 = vadd.f32 %v4555_v60, %v2583_v38  ;;  %v2586_v3 = vrot.slane %v3953_v33, 6  ;;  %v2519_v4 = vpop.f32.mrb[95].mxu0 }
 0x3b9   : > { %v2584_v35 = vrot.slane %v2519_v4, 6 }
 0x3ba   : > { %2642 = vst [vmem:[%s5588_s5 + $0x5e] sm:$0xff] %v2623_v34  ;;  %2643 = vst [vmem:[%s5588_s5 + $0x66] sm:$0xff] %v2624_v1 }
 0x3bb   : > { %v2585_v47 = vsel %vm2556_vm1, %v2582_v30, %v2584_v35  ;;  %v2587_v37 = vsel %vm2556_vm1, %v2584_v35, %v2586_v3 }
 0x3bc   : > { %v2625_v40 = vadd.f32 %v4556_v63, %v2585_v47  ;;  %v2626_v42 = vadd.f32 %v4557_v2, %v2587_v37 }
 0x3be   : > { %2644 = vst [vmem:[%s5588_s5 + $0x6e] sm:$0xff] %v2625_v40  ;;  %2645 = vst [vmem:[%s5588_s5 + $0x76] sm:$0xff] %v2626_v42 }
 0x3c1   : > { %v3956_v43 = vpop.f32.mrb[96].mxu0 }
 0x3c2   : > { %v2590_v8 = vrot.slane %v3956_v43, 6  ;;  %v2529_v32 = vpop.f32.mrb[97].mxu0 }
 0x3c3   : > { %v2588_v12 = vrot.slane %v2529_v32, 6 }
 0x3c4   : > { %v2629_v48 = vadd.f32 %v4558_v44, %v2590_v8 }
 0x3c5   : > { %v2589_v50 = vsel %vm2556_vm1, %v2586_v3, %v2588_v12  ;;  %v2591_v58 = vsel %vm2556_vm1, %v2588_v12, %v2590_v8 }
 0x3c6   : > { %2648 = vst [vmem:[%s5588_s5 + $0x8e] sm:$0x3] %v2629_v48  ;;  %v2627_v52 = vadd.f32 %v4559_v61, %v2589_v50  ;;  %v2628_v41 = vadd.f32 %v4560_v0, %v2591_v58 }
 0x3c8   : > { %2646 = vst [vmem:[%s5588_s5 + $0x7e] sm:$0xff] %v2627_v52  ;;  %2647 = vst [vmem:[%s5588_s5 + $0x86] sm:$0xff] %v2628_v41 }
 0x3c9   : > { %4574 = shalt.err (!%p4571_p7)
}
 0x3ca   : > { %s4575_s14 = scalar_lea.hbm %s5648_s24, 2304  ;;  %s4579_s8 = scalar_lea.hbm %s5710_s4, 9216 }
 0x3cb   : > { %p4576_p9 = scmp.ne.s32.totalorder %s5648_s24, %s4575_s14  ;;  %p4580_p12 = scmp.lt.u32.totalorder %s5648_s24, %s5710_s4 }
 0x3cc   : > { %p4581_p13 = scmp.lt.u32.totalorder %s4579_s8, %s4575_s14  ;;  %p4583_p1 = scmp.lt.u32.totalorder %s4575_s14, %s5648_s24 }
 0x3cd   : > { %p4577_p10 = pnand %p4576_p9, %p4739_p3 }
 0x3ce   : > { %p4582_p0 = por %p4581_p13, %p4580_p12 }
 0x3cf   : > { %p4578_p11 = pneg %p4577_p10 }
 0x3d0   : > { %p4584_p2 = por %p4583_p1, %p4582_p0 }
 0x3d2   : > { %p4585_p4 = pnand %p4584_p2, %p4578_p11 }
 0x3d4   : > { %4588 = shalt.err (!%p4585_p4)
}
 0x3d5   : > { %s4661_s19 = smov 128   ;;  %s4662_s13 = smov 8  }
 0x3d6   : > { %4466 = dma.vmem_to_hbm [thread:$0]  (%p4739_p3), %s5640_s11, 2304, %s5648_s24, %s5654_s9, %s4661_s19, %s4661_s19, %s4662_s13  }
 0x3d7 PF: > { %p4472_p5 = scmp.ge.s32.totalorder %s4655_s22, 2  ;;  %s2680_s10 = sand.u32 1, %s4627_s15  }
 0x3d8   : > { %s2681_s27 = scalar_lea.sflag [#allocation4], %s2680_s10 }
 0x3d9   : > { %p4469_p6 = pnand %p4472_p5, %p4748_p8 }
 0x3db   : > { %4622 = dma.done.wait (!%p4469_p6), %s2681_s27, 2304  }
 0x3dc   : > { %4624 = vsyncadd (!%p4469_p6), %s2681_s27, 4294964992  ;;  %s17_s22 = sadd.s32 1, %s4655_s22   ;;  %s5713_s15 = smov %s4631_s16 }
 0x3dd   : > { %p14_p7 = scmp.ge.s32.totalorder %s17_s22, 6   ;;  %s5714_s16 = smov %s4635_s17 }
 0x3de   : > { %s5715_s17 = smov %s4757_s7  ;;  %s5716_s18 = smov %s4647_s20 }
 0x3df   : > { %s5717_s19 = smov %s4651_s21  ;;  %s5718_s20 = smov %s5721_s25 }
 0x3e0   : > { %s5719_s21 = smov %s5725_s26  ;;  %16 = sbr.rel (!%p14_p7) target bundleno = 5 (0x5), region = 79 }
 0x3e7   :  { %2686 = vsyncpa [#allocation4], 1 }
 0x3e8   :  { %2688 = vsyncpa [#allocation4 + $0x1], 1 }

</bundles_post_ra>
